<compile_context>
chip_gen: v5e
topology: v5e:2x2
jax: 0.10.0
libtpu: 0.0.40
codegen_flags: <defaults>
</compile_context>

<pallas_src>
import functools

import jax
import jax.numpy as jnp
from jax.experimental import pallas as pl
from jax.experimental.pallas import tpu as pltpu

NCLASSES = 20
_VMEM_LIMIT = 44 * 1024 * 1024  # fits v7x (64 MiB phys); plenty of headroom on v5e/v6e


def _round_up(x, m):
    return (x + m - 1) // m * m


def _pick_tm(m):
    if m >= 2048:
        return 512
    if m >= 256:
        return 256
    return _round_up(max(m, 1), 8)


# --------------------------------------------------------------------------
# Kernel 1: fused matmul  out = act((A @ B) * scale + bias)
# used for: stem conv (im2col), conv1 of every block, final Linear.
# --------------------------------------------------------------------------

def _mm_kernel(relu):
    def kernel(a_ref, b_ref, s_ref, c_ref, o_ref):
        y = jnp.dot(a_ref[...], b_ref[...], preferred_element_type=jnp.float32)
        y = y * s_ref[...] + c_ref[...]
        if relu:
            y = jnp.maximum(y, 0.0)
        o_ref[...] = y.astype(o_ref.dtype)
    return kernel


def matmul_bn_act(a, w, scale, bias, relu, out_dtype=jnp.bfloat16):
    """a:(M,K); w:(K,N) bf16; scale/bias:(1,N) f32. Single full-K step per tile."""
    M, K = a.shape
    _, N = w.shape
    a = a.astype(jnp.bfloat16)
    tm = _pick_tm(M)
    Mp = _round_up(M, tm)
    if Mp != M:
        a = jnp.pad(a, ((0, Mp - M), (0, 0)))
    mb = Mp // tm
    # If the M grid collapsed to one block, split N so both v7x TensorCores get work.
    tn = N // 2 if (mb == 1 and N >= 256 and N % 256 == 0) else N
    nb = N // tn

    out = pl.pallas_call(
        _mm_kernel(relu),
        out_shape=jax.ShapeDtypeStruct((Mp, N), out_dtype),
        grid_spec=pltpu.PrefetchScalarGridSpec(
            num_scalar_prefetch=0,
            grid=(mb, nb),
            in_specs=[
                pl.BlockSpec((tm, K), lambda i, j: (i, 0)),
                pl.BlockSpec((K, tn), lambda i, j: (0, j)),
                pl.BlockSpec((1, tn), lambda i, j: (0, j)),
                pl.BlockSpec((1, tn), lambda i, j: (0, j)),
            ],
            out_specs=pl.BlockSpec((tm, tn), lambda i, j: (i, j)),
        ),
        compiler_params=pltpu.CompilerParams(
            dimension_semantics=("parallel", "parallel"),
            vmem_limit_bytes=_VMEM_LIMIT),
        cost_estimate=pl.CostEstimate(
            flops=2 * Mp * K * N, transcendentals=0,
            bytes_accessed=2 * (Mp * K + K * N + Mp * N)),
    )(a, w, scale, bias)
    return out[:M] if Mp != M else out


# --------------------------------------------------------------------------
# Kernel 2: fused bottleneck "tail"
#   h2  = relu(bn2(patches @ w2))           # conv2 3x3 as im2col matmul
#   y   = bn3(h2 @ w3)                      # conv3 1x1
#   id  = bn_d(xs @ wd)  or  residual input # optional downsample path
#   out = relu(y + id)
# Weights and h2 stay in VMEM; one pallas_call per block.
# --------------------------------------------------------------------------

def _block_tail_kernel(has_ds):
    def kernel(p_ref, w2_ref, s2_ref, b2_ref, w3_ref, s3_ref, b3_ref, *rest):
        if has_ds:
            xs_ref, wd_ref, sd_ref, bd_ref, o_ref = rest
        else:
            r_ref, o_ref = rest
        h2 = jnp.dot(p_ref[...], w2_ref[...], preferred_element_type=jnp.float32)
        h2 = jnp.maximum(h2 * s2_ref[...] + b2_ref[...], 0.0).astype(jnp.bfloat16)
        y = jnp.dot(h2, w3_ref[...], preferred_element_type=jnp.float32)
        y = y * s3_ref[...] + b3_ref[...]
        if has_ds:
            ident = jnp.dot(xs_ref[...], wd_ref[...],
                            preferred_element_type=jnp.float32)
            ident = ident * sd_ref[...] + bd_ref[...]
        else:
            ident = r_ref[...].astype(jnp.float32)
        o_ref[...] = jnp.maximum(y + ident, 0.0).astype(o_ref.dtype)
    return kernel


def block_tail(patches, w2, s2, b2, w3, s3, b3, extra, has_ds):
    M, K2 = patches.shape
    P = w2.shape[1]
    N3 = w3.shape[1]
    tm = min(_round_up(M, 8), 256)
    Mp = _round_up(M, tm)
    mb = Mp // tm

    def pad_m(x):
        return jnp.pad(x, ((0, Mp - M), (0, 0))) if Mp != M else x

    inputs = [pad_m(patches.astype(jnp.bfloat16)), w2, s2, b2, w3, s3, b3]
    in_specs = [
        pl.BlockSpec((tm, K2), lambda i: (i, 0)),
        pl.BlockSpec((K2, P), lambda i: (0, 0)),    # resident across M steps
        pl.BlockSpec((1, P), lambda i: (0, 0)),
        pl.BlockSpec((1, P), lambda i: (0, 0)),
        pl.BlockSpec((P, N3), lambda i: (0, 0)),
        pl.BlockSpec((1, N3), lambda i: (0, 0)),
        pl.BlockSpec((1, N3), lambda i: (0, 0)),
    ]
    flops = 2 * Mp * (K2 * P + P * N3)
    nbytes = 2 * (Mp * K2 + K2 * P + P * N3 + Mp * N3)
    if has_ds:
        xs, wd, sd, bd = extra
        cin = xs.shape[1]
        inputs += [pad_m(xs.astype(jnp.bfloat16)), wd, sd, bd]
        in_specs += [
            pl.BlockSpec((tm, cin), lambda i: (i, 0)),
            pl.BlockSpec((cin, N3), lambda i: (0, 0)),
            pl.BlockSpec((1, N3), lambda i: (0, 0)),
            pl.BlockSpec((1, N3), lambda i: (0, 0)),
        ]
        flops += 2 * Mp * cin * N3
        nbytes += 2 * (Mp * cin + cin * N3)
    else:
        (res,) = extra
        inputs += [pad_m(res.astype(jnp.bfloat16))]
        in_specs += [pl.BlockSpec((tm, N3), lambda i: (i, 0))]
        nbytes += 2 * Mp * N3

    # TODO(synk): for the tiny-M late stages (M=32) a weight-split over N3 would let
    # both v7x TensorCores share the (weight-bound) work; M-only grid kept for now.
    out = pl.pallas_call(
        _block_tail_kernel(has_ds),
        out_shape=jax.ShapeDtypeStruct((Mp, N3), jnp.bfloat16),
        grid_spec=pltpu.PrefetchScalarGridSpec(
            num_scalar_prefetch=0,
            grid=(mb,),
            in_specs=in_specs,
            out_specs=pl.BlockSpec((tm, N3), lambda i: (i, 0)),
        ),
        compiler_params=pltpu.CompilerParams(
            dimension_semantics=("parallel",),
            vmem_limit_bytes=_VMEM_LIMIT),
        cost_estimate=pl.CostEstimate(flops=flops, transcendentals=0,
                                      bytes_accessed=nbytes),
    )(*inputs)
    return out[:M] if Mp != M else out


# --------------------------------------------------------------------------
# XLA-side glue (im2col, pooling)
# --------------------------------------------------------------------------

def _im2col(x, k, stride, pad):
    """NHWC -> (N*Ho*Wo, k*k*C) patch matrix, tap-major (kh, kw, cin) columns."""
    N, H, W, C = x.shape
    Ho = (H + 2 * pad - k) // stride + 1
    Wo = (W + 2 * pad - k) // stride + 1
    if pad:
        x = jnp.pad(x, ((0, 0), (pad, pad), (pad, pad), (0, 0)))
    if k == 1 and stride == 1:
        patches = x
    else:
        cols = [x[:, kh:kh + stride * Ho:stride, kw:kw + stride * Wo:stride, :]
                for kh in range(k) for kw in range(k)]
        patches = jnp.concatenate(cols, axis=-1)
    return patches.reshape(N * Ho * Wo, k * k * C), Ho, Wo


def maxpool_3x3_s2_p1(x):
    """MaxPool2d(3, stride=2, padding=1) on NHWC. Plain 9-tap maximum tree."""
    N, H, W, C = x.shape
    Ho = (H - 1) // 2 + 1
    Wo = (W - 1) // 2 + 1
    xp = jnp.pad(x, ((0, 0), (1, 1), (1, 1), (0, 0)), constant_values=-jnp.inf)
    out = None
    for kh in range(3):
        for kw in range(3):
            tap = xp[:, kh:kh + 2 * Ho:2, kw:kw + 2 * Wo:2, :]
            out = tap if out is None else jnp.maximum(out, tap)
    return out


# --------------------------------------------------------------------------
# Network pieces (each is one jit -> one dispatch; shapes cached across blocks)
# --------------------------------------------------------------------------

@jax.jit
def stem(x_nchw, w, s, b):
    """conv 7x7/s2 + BN + ReLU (fused matmul) then maxpool 3x3/s2. NCHW f32 in."""
    x = jnp.transpose(x_nchw, (0, 2, 3, 1)).astype(jnp.bfloat16)  # NHWC bf16
    N = x.shape[0]
    patches, Ho, Wo = _im2col(x, 7, 2, 3)
    h = matmul_bn_act(patches, w, s, b, relu=True)
    return maxpool_3x3_s2_p1(h.reshape(N, Ho, Wo, w.shape[1]))


@functools.partial(jax.jit, static_argnames=("stride",))
def bottleneck_block(x, t, stride):
    """One bottleneck = 2 pallas_calls: conv1, then fused conv2+conv3(+ds)+residual."""
    N, H, W, Cin = x.shape
    planes = t["w1"].shape[1]
    h1 = matmul_bn_act(x.reshape(N * H * W, Cin), t["w1"], t["s1"], t["b1"],
                       relu=True)
    patches, Ho, Wo = _im2col(h1.reshape(N, H, W, planes), 3, stride, 1)
    if "wd" in t:
        xs = x[:, ::stride, ::stride, :].reshape(N * Ho * Wo, Cin)
        out = block_tail(patches, t["w2"], t["s2"], t["b2"],
                         t["w3"], t["s3"], t["b3"],
                         (xs, t["wd"], t["sd"], t["bd"]), has_ds=True)
    else:
        res = x.reshape(N * Ho * Wo, Cin)
        out = block_tail(patches, t["w2"], t["s2"], t["b2"],
                         t["w3"], t["s3"], t["b3"], (res,), has_ds=False)
    return out.reshape(N, Ho, Wo, planes * 4)


@jax.jit
def head(x, fc_w, fc_s, fc_b):
    """AdaptiveAvgPool2d((2,2)) + torch-style NCHW flatten + Linear(8192, 20)."""
    # TODO(synk): overlapping-bin AdaptiveAvgPool2d (H or W not divisible by 2) is not
    # implemented; the 128x128 input yields an exact 4x4 -> 2x2 pooling.
    N, H, W, C = x.shape
    xf = x.astype(jnp.float32).reshape(N, 2, H // 2, 2, W // 2, C)
    pooled = xf.mean(axis=(2, 4))                                   # (N, 2, 2, C)
    feat = jnp.transpose(pooled, (0, 3, 1, 2)).reshape(N, 4 * C)    # NCHW flatten
    return matmul_bn_act(feat, fc_w, fc_s, fc_b, relu=False, out_dtype=jnp.float32)


def resnet_forward(params, x_nchw):
    x = stem(x_nchw, params["w_stem"], params["s_stem"], params["b_stem"])
    for blocks in params["layers"]:
        for blk in blocks:
            x = bottleneck_block(x, blk["tensors"], stride=blk["stride"])
    return head(x, params["fc_w"], params["fc_s"], params["fc_b"])


# --------------------------------------------------------------------------
# Deterministic synthetic ResNet-152 parameters, pre-transformed into
# matmul-ready bf16 weight matrices + folded eval-mode BN (scale, bias).
# --------------------------------------------------------------------------

class KeyGen:
    def __init__(self, seed):
        self._key = jax.random.PRNGKey(seed)
        self._i = 0

    def __call__(self):
        self._i += 1
        return jax.random.fold_in(self._key, self._i)


def _raw_conv(rng, cout, cin, k):
    fan_in = cin * k * k
    # 0.5 * He scale keeps activations well-bounded through 50 residual blocks.
    return jax.random.normal(rng, (cout, cin, k, k), jnp.float32) * (
        0.5 * (2.0 / fan_in) ** 0.5)


def _raw_bn(rng, c):
    k1, k2, k3, k4 = jax.random.split(rng, 4)
    gamma = 1.0 + 0.1 * jax.random.normal(k1, (c,), jnp.float32)
    beta = 0.1 * jax.random.normal(k2, (c,), jnp.float32)
    mean = 0.05 * jax.random.normal(k3, (c,), jnp.float32)
    var = 1.0 + 0.1 * jax.random.uniform(k4, (c,), jnp.float32)
    scale = gamma / jnp.sqrt(var + 1e-5)
    bias = beta - mean * scale
    return scale, bias


def _prep_conv_weight(w):
    """OIHW -> (k*k*Cin, Cout) bf16, tap-major (kh, kw, cin) rows matching _im2col."""
    cout, cin, k, _ = w.shape
    return jnp.transpose(w, (2, 3, 1, 0)).reshape(k * k * cin, cout).astype(
        jnp.bfloat16)


def _prep_bn(scale, bias):
    return (scale.reshape(1, -1).astype(jnp.float32),
            bias.reshape(1, -1).astype(jnp.float32))


def make_resnet152_params(seed=0):
    kg = KeyGen(seed)

    def conv_w(cout, cin, k):
        return _prep_conv_weight(_raw_conv(kg(), cout, cin, k))

    def bn(c):
        return _prep_bn(*_raw_bn(kg(), c))

    params = {}
    params["w_stem"] = conv_w(64, 3, 7)
    params["s_stem"], params["b_stem"] = bn(64)

    # ResNet-152: bottleneck block counts [3, 8, 36, 3]
    layer_cfg = [(64, 3, 1), (128, 8, 2), (256, 36, 2), (512, 3, 2)]
    inplanes = 64
    layers = []
    for planes, nblocks, stride in layer_cfg:
        blocks = []
        for bi in range(nblocks):
            s_ = stride if bi == 0 else 1
            t = {}
            t["w1"] = conv_w(planes, inplanes, 1)
            t["s1"], t["b1"] = bn(planes)
            t["w2"] = conv_w(planes, planes, 3)
            t["s2"], t["b2"] = bn(planes)
            t["w3"] = conv_w(planes * 4, planes, 1)
            t["s3"], t["b3"] = bn(planes * 4)
            if bi == 0:
                t["wd"] = conv_w(planes * 4, inplanes, 1)
                t["sd"], t["bd"] = bn(planes * 4)
            blocks.append({"stride": s_, "tensors": t})
            inplanes = planes * 4
        layers.append(blocks)
    params["layers"] = layers

    # classifier: PyTorch Linear(8192, 20); fused as matmul with scale=1, bias=b.
    fc_w = jax.random.normal(kg(), (NCLASSES, 8192), jnp.float32) * (1.0 / 8192) ** 0.5
    fc_b = 0.01 * jax.random.normal(kg(), (NCLASSES,), jnp.float32)
    params["fc_w"] = fc_w.T.astype(jnp.bfloat16)                 # (8192, 20)
    params["fc_s"] = jnp.ones((1, NCLASSES), jnp.float32)
    params["fc_b"] = fc_b.reshape(1, NCLASSES).astype(jnp.float32)
    return params


if __name__ == "__main__":
    key = jax.random.PRNGKey(0)
    # 128x128 input (PyTorch NCHW): stem/maxpool -> 32x32, layers -> 4x4x2048,
    # adaptive pool (2,2) -> 8192 features, matching Linear(8192, 20).
    x = jax.random.normal(key, (2, 3, 128, 128), jnp.float32)
    params = make_resnet152_params(seed=0)
    logits = resnet_forward(params, x)
    logits = jax.block_until_ready(logits)
    assert logits.shape == (2, NCLASSES), logits.shape
    assert bool(jnp.all(jnp.isfinite(logits)))
    print("KERNEL_OK")
</pallas_src>

<mosaic_0001>
module attributes {stable_mosaic.version = 11 : i64} {
  func.func @kernel(%arg0: i32, %arg1: i32, %arg2: memref<512x147xbf16, #tpu.memory_space<vmem>>, %arg3: memref<147x64xbf16, #tpu.memory_space<vmem>>, %arg4: memref<1x64xf32, #tpu.memory_space<vmem>>, %arg5: memref<1x64xf32, #tpu.memory_space<vmem>>, %arg6: memref<512x64xbf16, #tpu.memory_space<vmem>>) attributes {dimension_semantics = [#tpu.dimension_semantics<parallel>, #tpu.dimension_semantics<parallel>], iteration_bounds = array<i64: 16, 1>, scalar_prefetch = 0 : i64, scratch_operands = 0 : i64, tpu.core_type = #tpu.core_type<tc>, window_params = [{transform_indices = @transform_0, window_bounds = array<i64: 512, 147>}, {transform_indices = @transform_1, window_bounds = array<i64: 147, 64>}, {transform_indices = @transform_2, window_bounds = array<i64: 1, 64>}, {transform_indices = @transform_3, window_bounds = array<i64: 1, 64>}, {transform_indices = @transform_4, window_bounds = array<i64: 512, 64>}]} {
    %c0 = arith.constant 0 : index
    %c0_0 = arith.constant 0 : index
    %0 = vector.load %arg2[%c0, %c0_0] : memref<512x147xbf16, #tpu.memory_space<vmem>>, vector<512x147xbf16>
    %c0_1 = arith.constant 0 : index
    %c0_2 = arith.constant 0 : index
    %1 = vector.load %arg3[%c0_1, %c0_2] : memref<147x64xbf16, #tpu.memory_space<vmem>>, vector<147x64xbf16>
    %cst = arith.constant dense<0.000000e+00> : vector<512x64xf32>
    %2 = tpu.matmul %0, %1, %cst {dimension_numbers = #tpu.dot_dimension_numbers<[1], [0], [0], [1], [0, 0, 1, 1], [], []>} : vector<512x147xbf16>, vector<147x64xbf16>, vector<512x64xf32> -> vector<512x64xf32>
    %c0_3 = arith.constant 0 : index
    %c0_4 = arith.constant 0 : index
    %3 = vector.load %arg4[%c0_3, %c0_4] : memref<1x64xf32, #tpu.memory_space<vmem>>, vector<1x64xf32>
    %4 = vector.broadcast %3 : vector<1x64xf32> to vector<512x64xf32>
    %5 = arith.mulf %2, %4 : vector<512x64xf32>
    %c0_5 = arith.constant 0 : index
    %c0_6 = arith.constant 0 : index
    %6 = vector.load %arg5[%c0_5, %c0_6] : memref<1x64xf32, #tpu.memory_space<vmem>>, vector<1x64xf32>
    %7 = vector.broadcast %6 : vector<1x64xf32> to vector<512x64xf32>
    %8 = arith.addf %5, %7 : vector<512x64xf32>
    %cst_7 = arith.constant 0.000000e+00 : f32
    %9 = vector.broadcast %cst_7 : f32 to vector<512x64xf32>
    %10 = arith.maximumf %8, %9 : vector<512x64xf32>
    %11 = arith.truncf %10 : vector<512x64xf32> to vector<512x64xbf16>
    %c0_8 = arith.constant 0 : index
    %c0_9 = arith.constant 0 : index
    %12 = vector.load %arg6[%c0_8, %c0_9] : memref<512x64xbf16, #tpu.memory_space<vmem>>, vector<512x64xbf16>
    tpu.vector_store %arg6[%c0_8, %c0_9], %11 {strides = array<i32>} : memref<512x64xbf16, #tpu.memory_space<vmem>>, vector<512x64xbf16>,
    return
  }
  func.func @transform_0(%arg0: i32, %arg1: i32) -> (i32, i32) {
    %c0_i32 = arith.constant 0 : i32
    %c0_i32_0 = arith.constant 0 : i32
    return %arg0, %c0_i32 : i32, i32
  }
  func.func @transform_1(%arg0: i32, %arg1: i32) -> (i32, i32) {
    %c0_i32 = arith.constant 0 : i32
    %c0_i32_0 = arith.constant 0 : i32
    return %c0_i32, %arg1 : i32, i32
  }
  func.func @transform_2(%arg0: i32, %arg1: i32) -> (i32, i32) {
    %c0_i32 = arith.constant 0 : i32
    %c0_i32_0 = arith.constant 0 : i32
    return %c0_i32, %arg1 : i32, i32
  }
  func.func @transform_3(%arg0: i32, %arg1: i32) -> (i32, i32) {
    %c0_i32 = arith.constant 0 : i32
    %c0_i32_0 = arith.constant 0 : i32
    return %c0_i32, %arg1 : i32, i32
  }
  func.func @transform_4(%arg0: i32, %arg1: i32) -> (i32, i32) {
    %c0_i32 = arith.constant 0 : i32
    return %arg0, %arg1 : i32, i32
  }
}

</mosaic_0001>

<bundles_post_ra>
// kernel: stem.1
= control target key start
LH: loop header
LB: loop body
LE: loop exit
PB: predicated region body
PF: predicated region fallthrough
CT: control target
= control target key end

     0   :  { %s2085_s15 = smov 0   ;;  %s2087_s16 = smov 0   ;;  %s2643_s0 = inlined_call_operand.vmem [shape: bf16[8192,147], index: 0, kind: input, shape index: {}]   ;;  %s2644_s1 = inlined_call_operand.vmem [shape: bf16[147,64], index: 1, kind: input, shape index: {}]   ;;  %s2645_s2 = inlined_call_operand.vmem [shape: f32[1,64], index: 2, kind: input, shape index: {}]   ;;  %s2646_s3 = inlined_call_operand.vmem [shape: f32[1,64], index: 3, kind: input, shape index: {}]   ;;  %s2647_s4 = inlined_call_operand.vmem [shape: bf16[8192,64], index: 4, kind: output, shape index: {}]  }
   0x1   :  { %s2089_s17 = smov 0  }
   0x2 LB: > { %s26_s18 = sadd.s32 1, %s2053_s16  ;;  %p1590_p0 = scmp.ge.s32.totalorder %s2057_s17, 1  ;;  %s2057_s17 = sphi %s2089_s17, %s14_s17   ;;  %s2053_s16 = sphi %s2087_s16, %s2649_s16   ;;  %s2049_s15 = sphi %s2085_s15, %s2648_s15  }
   0x3   : > { %p28_p1 = scmp.ge.s32.totalorder %s26_s18, 16  ;;  %p203_p2 = scmp.lt.s32.totalorder %s2057_s17, 17 }
   0x5   : > { %s2651_s18 = smov (%p28_p1, %s26_s18), 0  ;;  %p204_p3 = pnand %p1590_p0, %p203_p2 }
   0x6   : > { %s1591_s23 = sshll.u32 (!%p204_p3), %s2049_s15, 6 }
   0x7   : > { %207 = sbr.rel (%p204_p3) target bundleno = 435 (0x1b3), region = 36  ;;  %p244_p4 = scmp.lt.s32.totalorder (!%p204_p3), %s1591_s23, 1023 }
   0xc   : > { %v1994_v0 = vld [vmem:[%s2644_s1 + $0x38] sm:$0xff]  ;;  %v352_v1 = vld [vmem:[%s2644_s1 + $0x48] sm:$0x3]  ;;  %vm795_vm0 = vcmask 1040384   ;;  %vm796_vm1 = vcmask 1041408   ;;  %v1993_v3 = vld [vmem:[%s2644_s1 + $0x30] sm:$0xff] }
   0xd   : > { %v678_v2 = vunpack.c.l.b16 %v352_v1  ;;  %802 = vmatpush.bf16.msra.mxu0 %v1994_v0  ;;  %1996 = vmatpush.bf16.msra.mxu2 %v1994_v0  ;;  %v2059_v4 = vmov 65535   ;;  %s2653_s23 = smov (!%p244_p4, %s1591_s23), 1023  ;;  %v1992_v9 = vld [vmem:[%s2644_s1 + $0x28] sm:$0xff]  ;;  %v1995_v10 = vld [vmem:[%s2644_s1 + $0x40] sm:$0xff]  ;;  %vm698_vm2 = vcmask 154624   ;;  %v1990_v18 = vld [vmem:[%s2644_s1 + $0x18] sm:$0xff] }
   0xe   : > { %v797_v5 = vsel %vm795_vm0, 4294967295, %v2059_v4  ;;  %s1922_s28 = sshll.u32 %s2653_s23, 3  ;;  %v1991_v14 = vld [vmem:[%s2644_s1 + $0x20] sm:$0xff]  ;;  %v1989_v19 = vld [vmem:[%s2644_s1 + $0x10] sm:$0xff]  ;;  %v1988_v20 = vld [vmem:[%s2644_s1 + $0x8] sm:$0xff]  ;;  %s1595_s26 = sshll.u32 %s2653_s23, 2 }
   0xf   : > { %v688_v6 = vpack.c.b16 %v678_v2, %v678_v2  ;;  %v798_v7 = vsel %vm796_vm1, %v797_v5, 0  ;;  %s2124_s7 = scalar_lea.vmem %s2643_s0, %s1922_s28  ;;  %v1987_v26 = vld [vmem:[%s2644_s1] sm:$0xff]  ;;  %s2261_s29 = scalar_lea.vmem %s2647_s4, %s1595_s26  ;;  %vm1404_vm3 = vcmask 519168  }
  0x10   : > { %v1923_v11 = vld [vmem:[%s2124_s7 + $0x4] sm:$0xf]  ;;  %v1600_v12 = vld [vmem:[%s2124_s7 + $0x8] sm:$0xf0]  ;;  %v1957_v15 = vld [vmem:[%s2124_s7 + $0x114] sm:$0xf] }
  0x11   : > { %v800_v8 = vand.u32 %v798_v7, %v688_v6  ;;  %803 = vmatpush.bf16.msra.mxu0 %v1993_v3  ;;  %1997 = vmatpush.bf16.msra.mxu2 %v1993_v3  ;;  %v1603_v13 = vor.u32 %v1923_v11, %v1600_v12  ;;  %v1736_v16 = vld [vmem:[%s2124_s7 + $0x118] sm:$0xf0]  ;;  %v1925_v21 = vld [vmem:[%s2124_s7 + $0x14] sm:$0xf]  ;;  %v1959_v23 = vld [vmem:[%s2124_s7 + $0x124] sm:$0xf] }
  0x12   : > { %v1739_v17 = vor.u32 %v1957_v15, %v1736_v16  ;;  %v1608_v22 = vld [vmem:[%s2124_s7 + $0x18] sm:$0xf0]  ;;  %v1744_v24 = vld [vmem:[%s2124_s7 + $0x128] sm:$0xf0]  ;;  %v1598_v27 = vld [vmem:[%s2124_s7] sm:$0xf] }
  0x13   : > { %977 = vmatpush.bf16.msra.mxu1 %v800_v8  ;;  %2004 = vmatpush.bf16.msra.mxu3 %v800_v8  ;;  %v1611_v25 = vor.u32 %v1925_v21, %v1608_v22  ;;  %v1924_v28 = vld [vmem:[%s2124_s7 + $0x4] sm:$0xf0]  ;;  %v1726_v29 = vld [vmem:[%s2124_s7 + $0x100] sm:$0xf]  ;;  %v1747_v31 = vor.u32 %v1959_v23, %v1744_v24  ;;  %v1927_v34 = vld [vmem:[%s2124_s7 + $0x24] sm:$0xf] }
  0x14   : > { %v1956_v30 = vld [vmem:[%s2124_s7 + $0x104] sm:$0xf0]  ;;  %v1599_v32 = vor.u32 %v1924_v28, %v1598_v27  ;;  %v1616_v35 = vld [vmem:[%s2124_s7 + $0x28] sm:$0xf0]  ;;  %v1961_v36 = vld [vmem:[%s2124_s7 + $0x134] sm:$0xf] }
  0x15   : > { %804 = vmatpush.bf16.msra.mxu0 %v1992_v9  ;;  %1998 = vmatpush.bf16.msra.mxu2 %v1992_v9  ;;  %v1727_v33 = vor.u32 %v1956_v30, %v1726_v29  ;;  %v1752_v37 = vld [vmem:[%s2124_s7 + $0x138] sm:$0xf0]  ;;  %v1619_v38 = vor.u32 %v1927_v34, %v1616_v35  ;;  %v1606_v39 = vld [vmem:[%s2124_s7 + $0x10] sm:$0xf]  ;;  %v1926_v40 = vld [vmem:[%s2124_s7 + $0x14] sm:$0xf0] }
  0x16   : > { %v1734_v41 = vld [vmem:[%s2124_s7 + $0x110] sm:$0xf]  ;;  %v1958_v42 = vld [vmem:[%s2124_s7 + $0x114] sm:$0xf0]  ;;  %v1755_v43 = vor.u32 %v1961_v36, %v1752_v37  ;;  %v1607_v44 = vor.u32 %v1926_v40, %v1606_v39  ;;  %v1929_v46 = vld [vmem:[%s2124_s7 + $0x34] sm:$0xf] }
  0x17   : > { %978 = vmatpush.bf16.msra.mxu1 %v1995_v10  ;;  %2005 = vmatpush.bf16.msra.mxu3 %v1995_v10  ;;  %v1735_v45 = vor.u32 %v1958_v42, %v1734_v41  ;;  %v1624_v47 = vld [vmem:[%s2124_s7 + $0x38] sm:$0xf0]  ;;  %v1963_v48 = vld [vmem:[%s2124_s7 + $0x144] sm:$0xf]  ;;  %v1760_v49 = vld [vmem:[%s2124_s7 + $0x148] sm:$0xf0] }
  0x18   : > { %v1627_v50 = vor.u32 %v1929_v46, %v1624_v47  ;;  %v1614_v51 = vld [vmem:[%s2124_s7 + $0x20] sm:$0xf]  ;;  %v1928_v52 = vld [vmem:[%s2124_s7 + $0x24] sm:$0xf0]  ;;  %v1763_v55 = vor.u32 %v1963_v48, %v1760_v49  ;;  %v1931_v58 = vld [vmem:[%s2124_s7 + $0x44] sm:$0xf] }
  0x19   : > { %805 = vmatpush.bf16.msra.mxu0 %v1991_v14  ;;  %1999 = vmatpush.bf16.msra.mxu2 %v1991_v14  ;;  %v1742_v53 = vld [vmem:[%s2124_s7 + $0x120] sm:$0xf]  ;;  %v1960_v54 = vld [vmem:[%s2124_s7 + $0x124] sm:$0xf0]  ;;  %v1615_v56 = vor.u32 %v1928_v52, %v1614_v51  ;;  %v1632_v59 = vld [vmem:[%s2124_s7 + $0x48] sm:$0xf0] }
  0x1a   : > { %1888 = vmatmul.msk.bf16.vlgmr.msra.gmra.mxu1 %vm698_vm2, %v1603_v13  ;;  %1905 = vmatmul.msk.bf16.vlgmr.msra.gmra.mxu3 %vm698_vm2, %v1739_v17  ;;  %v1743_v57 = vor.u32 %v1960_v54, %v1742_v53  ;;  %v1965_v60 = vld [vmem:[%s2124_s7 + $0x154] sm:$0xf]  ;;  %v1768_v61 = vld [vmem:[%s2124_s7 + $0x158] sm:$0xf0]  ;;  %v1635_v62 = vor.u32 %v1931_v58, %v1632_v59  ;;  %v1622_v63 = vld [vmem:[%s2124_s7 + $0x30] sm:$0xf] }
  0x1b   : > { %v1930_v0 = vld [vmem:[%s2124_s7 + $0x34] sm:$0xf0]  ;;  %v1750_v1 = vld [vmem:[%s2124_s7 + $0x130] sm:$0xf]  ;;  %v1771_v3 = vor.u32 %v1965_v60, %v1768_v61  ;;  %v1933_v6 = vld [vmem:[%s2124_s7 + $0x54] sm:$0xf] }
  0x1c   : > { %v1962_v2 = vld [vmem:[%s2124_s7 + $0x134] sm:$0xf0]  ;;  %v1623_v4 = vor.u32 %v1930_v0, %v1622_v63  ;;  %v1640_v7 = vld [vmem:[%s2124_s7 + $0x58] sm:$0xf0]  ;;  %v1967_v8 = vld [vmem:[%s2124_s7 + $0x164] sm:$0xf] }
  0x1d   : > { %806 = vmatpush.bf16.msra.mxu0 %v1990_v18  ;;  %2000 = vmatpush.bf16.msra.mxu2 %v1990_v18  ;;  %v1751_v5 = vor.u32 %v1962_v2, %v1750_v1  ;;  %v1776_v9 = vld [vmem:[%s2124_s7 + $0x168] sm:$0xf0]  ;;  %v1643_v10 = vor.u32 %v1933_v6, %v1640_v7  ;;  %v1630_v11 = vld [vmem:[%s2124_s7 + $0x40] sm:$0xf]  ;;  %v1932_v12 = vld [vmem:[%s2124_s7 + $0x44] sm:$0xf0] }
  0x1e   : > { %v1758_v13 = vld [vmem:[%s2124_s7 + $0x140] sm:$0xf]  ;;  %v1964_v14 = vld [vmem:[%s2124_s7 + $0x144] sm:$0xf0]  ;;  %v1779_v15 = vor.u32 %v1967_v8, %v1776_v9  ;;  %v1631_v16 = vor.u32 %v1932_v12, %v1630_v11  ;;  %v1935_v18 = vld [vmem:[%s2124_s7 + $0x64] sm:$0xf] }
  0x1f   : > { %v1759_v17 = vor.u32 %v1964_v14, %v1758_v13  ;;  %v1784_v21 = vld [vmem:[%s2124_s7 + $0x178] sm:$0xf0]  ;;  %v1638_v23 = vld [vmem:[%s2124_s7 + $0x50] sm:$0xf]  ;;  %v1934_v24 = vld [vmem:[%s2124_s7 + $0x54] sm:$0xf0] }
  0x20   : > { %v1639_v28 = vor.u32 %v1934_v24, %v1638_v23  ;;  %v1937_v30 = vld [vmem:[%s2124_s7 + $0x74] sm:$0xf]  ;;  %v1646_v35 = vld [vmem:[%s2124_s7 + $0x60] sm:$0xf]  ;;  %v1936_v36 = vld [vmem:[%s2124_s7 + $0x64] sm:$0xf0] }
  0x21   : > { %807 = vmatpush.bf16.msra.mxu0 %v1989_v19  ;;  %2001 = vmatpush.bf16.msra.mxu2 %v1989_v19  ;;  %v1648_v19 = vld [vmem:[%s2124_s7 + $0x68] sm:$0xf0]  ;;  %v1774_v37 = vld [vmem:[%s2124_s7 + $0x160] sm:$0xf]  ;;  %v1647_v40 = vor.u32 %v1936_v36, %v1646_v35  ;;  %v1939_v42 = vld [vmem:[%s2124_s7 + $0x84] sm:$0xf] }
  0x22   : > { %v1651_v22 = vor.u32 %v1935_v18, %v1648_v19  ;;  %v1654_v47 = vld [vmem:[%s2124_s7 + $0x70] sm:$0xf]  ;;  %v1938_v48 = vld [vmem:[%s2124_s7 + $0x74] sm:$0xf0]  ;;  %v1672_v58 = vld [vmem:[%s2124_s7 + $0x98] sm:$0xf0] }
  0x23   : > { %v1970_v51 = vld [vmem:[%s2124_s7 + $0x174] sm:$0xf0]  ;;  %v1655_v53 = vor.u32 %v1938_v48, %v1654_v47  ;;  %v1975_v59 = vld [vmem:[%s2124_s7 + $0x1a4] sm:$0xf]  ;;  %v1808_v60 = vld [vmem:[%s2124_s7 + $0x1a8] sm:$0xf0] }
  0x24   : > { %v1940_v63 = vld [vmem:[%s2124_s7 + $0x84] sm:$0xf0]  ;;  %v1790_v2 = vld [vmem:[%s2124_s7 + $0x180] sm:$0xf]  ;;  %v1816_v23 = vld [vmem:[%s2124_s7 + $0x1b8] sm:$0xf0] }
  0x25   : > { %808 = vmatpush.bf16.msra.mxu0 %v1988_v20  ;;  %2002 = vmatpush.bf16.msra.mxu2 %v1988_v20  ;;  %v1969_v20 = vld [vmem:[%s2124_s7 + $0x174] sm:$0xf] }
  0x26   : > { %v1787_v27 = vor.u32 %v1969_v20, %v1784_v21  ;;  %v1943_v20 = vld [vmem:[%s2124_s7 + $0xa4] sm:$0xf]  ;;  %v1680_v21 = vld [vmem:[%s2124_s7 + $0xa8] sm:$0xf0] }
  0x29   : > { %809 = vmatpush.bf16.msra.mxu0 %v1987_v26  ;;  %2003 = vmatpush.bf16.msra.mxu2 %v1987_v26  ;;  %v1966_v26 = vld [vmem:[%s2124_s7 + $0x154] sm:$0xf0] }
  0x2a   : > { %1889 = vmatmul.msk.bf16.gmra.mxu1 %vm698_vm2, %v1611_v25  ;;  %1906 = vmatmul.msk.bf16.gmra.mxu3 %vm698_vm2, %v1747_v31  ;;  %v1766_v25 = vld [vmem:[%s2124_s7 + $0x150] sm:$0xf]  ;;  %v1656_v31 = vld [vmem:[%s2124_s7 + $0x78] sm:$0xf0] }
  0x2b   : > { %v1767_v29 = vor.u32 %v1966_v26, %v1766_v25  ;;  %v1659_v34 = vor.u32 %v1937_v30, %v1656_v31  ;;  %v1683_v25 = vor.u32 %v1943_v20, %v1680_v21  ;;  %v1670_v26 = vld [vmem:[%s2124_s7 + $0x90] sm:$0xf] }
  0x2c   : > { %810 = vmatmul.bf16.vlgmr.msra.gmra.mxu0 %v1599_v32  ;;  %890 = vmatmul.bf16.vlgmr.msra.gmra.mxu2 %v1727_v33  ;;  %v1971_v32 = vld [vmem:[%s2124_s7 + $0x184] sm:$0xf]  ;;  %v1792_v33 = vld [vmem:[%s2124_s7 + $0x188] sm:$0xf0]  ;;  %v1798_v31 = vld [vmem:[%s2124_s7 + $0x190] sm:$0xf] }
  0x2d   : > { %v1795_v39 = vor.u32 %v1971_v32, %v1792_v33  ;;  %v1974_v32 = vld [vmem:[%s2124_s7 + $0x194] sm:$0xf0] }
  0x3a   : > { %1890 = vmatmul.msk.bf16.gmra.mxu1 %vm698_vm2, %v1619_v38  ;;  %1907 = vmatmul.msk.bf16.gmra.mxu3 %vm698_vm2, %v1755_v43  ;;  %v1968_v38 = vld [vmem:[%s2124_s7 + $0x164] sm:$0xf0]  ;;  %v1664_v43 = vld [vmem:[%s2124_s7 + $0x88] sm:$0xf0] }
  0x3b   : > { %v1775_v41 = vor.u32 %v1968_v38, %v1774_v37  ;;  %v1667_v46 = vor.u32 %v1939_v42, %v1664_v43  ;;  %v1799_v38 = vor.u32 %v1974_v32, %v1798_v31  ;;  %v1947_v32 = vld [vmem:[%s2124_s7 + $0xc4] sm:$0xf] }
  0x3c   : > { %815 = vmatmul.bf16.gmra.mxu0 %v1607_v44  ;;  %895 = vmatmul.bf16.gmra.mxu2 %v1735_v45  ;;  %v1973_v44 = vld [vmem:[%s2124_s7 + $0x194] sm:$0xf]  ;;  %v1800_v45 = vld [vmem:[%s2124_s7 + $0x198] sm:$0xf0] }
  0x3d   : > { %v1803_v52 = vor.u32 %v1973_v44, %v1800_v45 }
  0x4a   : > { %1891 = vmatmul.msk.bf16.gmra.mxu1 %vm698_vm2, %v1627_v50  ;;  %1908 = vmatmul.msk.bf16.gmra.mxu3 %vm698_vm2, %v1763_v55  ;;  %v1782_v50 = vld [vmem:[%s2124_s7 + $0x170] sm:$0xf] }
  0x4b   : > { %v1783_v54 = vor.u32 %v1970_v51, %v1782_v50  ;;  %v1945_v51 = vld [vmem:[%s2124_s7 + $0xb4] sm:$0xf] }
  0x4c   : > { %820 = vmatmul.bf16.gmra.mxu0 %v1615_v56  ;;  %900 = vmatmul.bf16.gmra.mxu2 %v1743_v57  ;;  %v1941_v57 = vld [vmem:[%s2124_s7 + $0x94] sm:$0xf] }
  0x4d   : > { %v1675_v61 = vor.u32 %v1941_v57, %v1672_v58 }
  0x5a   : > { %1892 = vmatmul.msk.bf16.gmra.mxu1 %vm698_vm2, %v1635_v62  ;;  %1909 = vmatmul.msk.bf16.gmra.mxu3 %vm698_vm2, %v1771_v3  ;;  %v1662_v62 = vld [vmem:[%s2124_s7 + $0x80] sm:$0xf]  ;;  %v1972_v3 = vld [vmem:[%s2124_s7 + $0x184] sm:$0xf0] }
  0x5b   : > { %v1663_v6 = vor.u32 %v1940_v63, %v1662_v62  ;;  %v1791_v8 = vor.u32 %v1972_v3, %v1790_v2  ;;  %v1976_v2 = vld [vmem:[%s2124_s7 + $0x1a4] sm:$0xf0] }
  0x5c   : > { %825 = vmatmul.bf16.gmra.mxu0 %v1623_v4  ;;  %905 = vmatmul.bf16.gmra.mxu2 %v1751_v5  ;;  %v1811_v4 = vor.u32 %v1975_v59, %v1808_v60  ;;  %v2242_v5 = vld [vmem:[%s2645_s2] ss:$0 sm:$0xff] }
  0x5d   : > { %v1678_v60 = vld [vmem:[%s2124_s7 + $0xa0] sm:$0xf] }
  0x6a   : > { %1893 = vmatmul.msk.bf16.gmra.mxu1 %vm698_vm2, %v1643_v10  ;;  %1910 = vmatmul.msk.bf16.gmra.mxu3 %vm698_vm2, %v1779_v15  ;;  %v2248_v10 = vld [vmem:[%s2646_s3] ss:$0 sm:$0xff] }
  0x6c   : > { %830 = vmatmul.bf16.gmra.mxu0 %v1631_v16  ;;  %910 = vmatmul.bf16.gmra.mxu2 %v1759_v17 }
  0x7a   : > { %1894 = vmatmul.msk.bf16.gmra.mxu1 %vm698_vm2, %v1651_v22  ;;  %1911 = vmatmul.msk.bf16.gmra.mxu3 %vm698_vm2, %v1787_v27  ;;  %v1977_v22 = vld [vmem:[%s2124_s7 + $0x1b4] sm:$0xf]  ;;  %v1942_v27 = vld [vmem:[%s2124_s7 + $0x94] sm:$0xf0] }
  0x7b   : > { %v1819_v33 = vor.u32 %v1977_v22, %v1816_v23  ;;  %v1671_v36 = vor.u32 %v1942_v27, %v1670_v26 }
  0x7c   : > { %835 = vmatmul.bf16.gmra.mxu0 %v1639_v28  ;;  %915 = vmatmul.bf16.gmra.mxu2 %v1767_v29 }
  0x8a   : > { %1895 = vmatmul.msk.bf16.gmra.mxu1 %vm698_vm2, %v1659_v34  ;;  %1912 = vmatmul.msk.bf16.gmra.mxu3 %vm698_vm2, %v1795_v39 }
  0x8c   : > { %840 = vmatmul.bf16.gmra.mxu0 %v1647_v40  ;;  %920 = vmatmul.bf16.gmra.mxu2 %v1775_v41 }
  0x97   : > { %v980_v49 = vpop.f32.mrf.mxu1 }
  0x9a   : > { %1896 = vmatmul.msk.bf16.gmra.mxu1 %vm698_vm2, %v1667_v46  ;;  %1913 = vmatmul.msk.bf16.gmra.mxu3 %vm698_vm2, %v1803_v52  ;;  %v1688_v52 = vld [vmem:[%s2124_s7 + $0xb8] sm:$0xf0] }
  0x9b   : > { %v1691_v59 = vor.u32 %v1945_v51, %v1688_v52 }
  0x9c   : > { %845 = vmatmul.bf16.gmra.mxu0 %v1655_v53  ;;  %925 = vmatmul.bf16.gmra.mxu2 %v1783_v54  ;;  %v1979_v54 = vld [vmem:[%s2124_s7 + $0x1c4] sm:$0xf] }
  0x9d   : > { %v2227_v55 = vpop.f32.mrf.mxu3 }
  0x9f   : > { %v982_v56 = vpop.f32.mrf.mxu1 }
  0xa5   : > { %v2235_v0 = vpop.f32.mrf.mxu3 }
  0xa7   : > { %v985_v1 = vpop.f32.mrf.mxu1 }
  0xa9   : > { %v811_v7 = vpop.f32.mrf.mxu0 }
  0xaa   : > { %1897 = vmatmul.msk.bf16.gmra.mxu1 %vm698_vm2, %v1675_v61  ;;  %v981_v9 = vadd.f32 %v980_v49, %v811_v7  ;;  %1914 = vmatmul.msk.bf16.gmra.mxu3 %vm698_vm2, %v1811_v4 }
  0xac   : > { %v1144_v11 = vmul.f32 %v2242_v5, %v981_v9  ;;  %850 = vmatmul.bf16.gmra.mxu0 %v1663_v6  ;;  %930 = vmatmul.bf16.gmra.mxu2 %v1791_v8 }
  0xad   : > { %v2252_v12 = vpop.f32.mrf.mxu3 }
  0xae   : > { %v1212_v13 = vadd.f32 %v2248_v10, %v1144_v11 }
  0xaf   : > { %v987_v14 = vpop.f32.mrf.mxu1  ;;  %v2256_v16 = vpop.f32.mrf.mxu2 }
  0xb0   : > { %v1276_v15 = vmax.f32 %v1212_v13, 0.0 }
  0xb1   : > { %v813_v17 = vpop.f32.mrf.mxu0 }
  0xb2   : > { %v1340_v18 = vpack.c.bf16 %v1276_v15, %v1276_v15  ;;  %v983_v19 = vadd.f32 %v982_v56, %v813_v17  ;;  %v1824_v56 = vld [vmem:[%s2124_s7 + $0x1c8] sm:$0xf0] }
  0xb3   : > { %v1827_v3 = vor.u32 %v1979_v54, %v1824_v56 }
  0xb4   : > { %1405 = vst.msk [vmem:[%s2261_s29] sm:$0xf] %vm1404_vm3, %v1340_v18  ;;  %v1145_v24 = vmul.f32 %v2242_v5, %v983_v19 }
  0xb5   : > { %v2272_v28 = vpop.f32.mrf.mxu3 }
  0xb6   : > { %v1213_v29 = vadd.f32 %v2248_v10, %v1145_v24 }
  0xb7   : > { %v990_v30 = vpop.f32.mrf.mxu1  ;;  %v2277_v35 = vpop.f32.mrf.mxu2 }
  0xb8   : > { %v1277_v34 = vmax.f32 %v1213_v29, 0.0 }
  0xb9   : > { %v816_v37 = vpop.f32.mrf.mxu0 }
  0xba   : > { %1898 = vmatmul.msk.bf16.gmra.mxu1 %vm698_vm2, %v1683_v25  ;;  %v1341_v39 = vpack.c.bf16 %v1277_v34, %v1277_v34  ;;  %v986_v40 = vadd.f32 %v985_v1, %v816_v37  ;;  %1915 = vmatmul.msk.bf16.gmra.mxu3 %vm698_vm2, %v1819_v33  ;;  %v1806_v1 = vld [vmem:[%s2124_s7 + $0x1a0] sm:$0xf]  ;;  %v1696_v33 = vld [vmem:[%s2124_s7 + $0xc8] sm:$0xf0]  ;;  %v1832_v37 = vld [vmem:[%s2124_s7 + $0x1d8] sm:$0xf0] }
  0xbc   : > { %1406 = vst.msk [vmem:[%s2261_s29 + $0x4] sm:$0xf] %vm1404_vm3, %v1341_v39  ;;  %v1146_v41 = vmul.f32 %v2242_v5, %v986_v40  ;;  %855 = vmatmul.bf16.gmra.mxu0 %v1671_v36  ;;  %935 = vmatmul.bf16.gmra.mxu2 %v1799_v38  ;;  %v1981_v36 = vld [vmem:[%s2124_s7 + $0x1d4] sm:$0xf]  ;;  %v1686_v40 = vld [vmem:[%s2124_s7 + $0xb0] sm:$0xf] }
  0xbd   : > { %v2284_v42 = vpop.f32.mrf.mxu3 }
  0xbe   : > { %v1214_v43 = vadd.f32 %v2248_v10, %v1146_v41  ;;  %v1946_v41 = vld [vmem:[%s2124_s7 + $0xb4] sm:$0xf0] }
  0xbf   : > { %v992_v44 = vpop.f32.mrf.mxu1  ;;  %v896_v46 = vpop.f32.mrf.mxu2  ;;  %v1687_v52 = vor.u32 %v1946_v41, %v1686_v40 }
  0xc0   : > { %v1278_v45 = vmax.f32 %v1214_v43, 0.0  ;;  %v1066_v47 = vadd.f32 %v2227_v55, %v896_v46  ;;  %v1944_v55 = vld [vmem:[%s2124_s7 + $0xa4] sm:$0xf0]  ;;  %v1814_v46 = vld [vmem:[%s2124_s7 + $0x1b0] sm:$0xf] }
  0xc1   : > { %v818_v48 = vpop.f32.mrf.mxu0  ;;  %v1679_v8 = vor.u32 %v1944_v55, %v1678_v60 }
  0xc2   : > { %v1342_v49 = vpack.c.bf16 %v1278_v45, %v1278_v45  ;;  %v988_v50 = vadd.f32 %v987_v14, %v818_v48  ;;  %v1178_v53 = vmul.f32 %v2242_v5, %v1066_v47  ;;  %v1807_v14 = vor.u32 %v1976_v2, %v1806_v1  ;;  %v1978_v47 = vld [vmem:[%s2124_s7 + $0x1b4] sm:$0xf0] }
  0xc3   : > { %v1835_v48 = vor.u32 %v1981_v36, %v1832_v37 }
  0xc4   : > { %1407 = vst.msk [vmem:[%s2261_s29 + $0x8] sm:$0xf] %vm1404_vm3, %v1342_v49  ;;  %v1147_v57 = vmul.f32 %v2242_v5, %v988_v50  ;;  %v1246_v58 = vadd.f32 %v2248_v10, %v1178_v53 }
  0xc5   : > { %v2299_v61 = vpop.f32.mrf.mxu3 }
  0xc6   : > { %v1215_v62 = vadd.f32 %v2248_v10, %v1147_v57  ;;  %v1310_v4 = vmax.f32 %v1246_v58, 0.0  ;;  %v1815_v57 = vor.u32 %v1978_v47, %v1814_v46 }
  0xc7   : > { %v995_v63 = vpop.f32.mrf.mxu1  ;;  %v898_v7 = vpop.f32.mrf.mxu2 }
  0xc8   : > { %v1279_v6 = vmax.f32 %v1215_v62, 0.0  ;;  %v1374_v9 = vpack.c.bf16 %v1310_v4, %v1310_v4  ;;  %v1068_v11 = vadd.f32 %v2235_v0, %v898_v7 }
  0xc9   : > { %v821_v13 = vpop.f32.mrf.mxu0 }
  0xca   : > { %1899 = vmatmul.msk.bf16.gmra.mxu1 %vm698_vm2, %v1691_v59  ;;  %v1343_v15 = vpack.c.bf16 %v1279_v6, %v1279_v6  ;;  %v991_v17 = vadd.f32 %v990_v30, %v821_v13  ;;  %1916 = vmatmul.msk.bf16.gmra.mxu3 %vm698_vm2, %v1827_v3  ;;  %1439 = vst.msk [vmem:[%s2261_s29 + $0x88] sm:$0xf] %vm1404_vm3, %v1374_v9  ;;  %v1949_v13 = vld [vmem:[%s2124_s7 + $0xd4] sm:$0xf] }
  0xcb   : > { %v1179_v18 = vmul.f32 %v2242_v5, %v1068_v11 }
  0xcc   : > { %1408 = vst.msk [vmem:[%s2261_s29 + $0xc] sm:$0xf] %vm1404_vm3, %v1343_v15  ;;  %v1148_v19 = vmul.f32 %v2242_v5, %v991_v17  ;;  %860 = vmatmul.bf16.gmra.mxu0 %v1679_v8  ;;  %940 = vmatmul.bf16.gmra.mxu2 %v1807_v14  ;;  %v1704_v14 = vld [vmem:[%s2124_s7 + $0xd8] sm:$0xf0]  ;;  %v1983_v17 = vld [vmem:[%s2124_s7 + $0x1e4] sm:$0xf] }
  0xcd   : > { %v1247_v0 = vadd.f32 %v2248_v10, %v1179_v18  ;;  %v2314_v20 = vpop.f32.mrf.mxu3  ;;  %v1840_v18 = vld [vmem:[%s2124_s7 + $0x1e8] sm:$0xf0] }
  0xce   : > { %v1216_v21 = vadd.f32 %v2248_v10, %v1148_v19 }
  0xcf   : > { %v997_v22 = vpop.f32.mrf.mxu1  ;;  %v1311_v23 = vmax.f32 %v1247_v0, 0.0  ;;  %v901_v25 = vpop.f32.mrf.mxu2 }
  0xd0   : > { %v1280_v24 = vmax.f32 %v1216_v21, 0.0  ;;  %v1071_v27 = vadd.f32 %v2252_v12, %v901_v25  ;;  %v1699_v12 = vor.u32 %v1947_v32, %v1696_v33  ;;  %v1694_v21 = vld [vmem:[%s2124_s7 + $0xc0] sm:$0xf] }
  0xd1   : > { %v1375_v26 = vpack.c.bf16 %v1311_v23, %v1311_v23  ;;  %v823_v29 = vpop.f32.mrf.mxu0  ;;  %v1948_v23 = vld [vmem:[%s2124_s7 + $0xc4] sm:$0xf0] }
  0xd2   : > { %v1344_v30 = vpack.c.bf16 %v1280_v24, %v1280_v24  ;;  %v993_v31 = vadd.f32 %v992_v44, %v823_v29  ;;  %v1180_v34 = vmul.f32 %v2242_v5, %v1071_v27  ;;  %v1980_v27 = vld [vmem:[%s2124_s7 + $0x1c4] sm:$0xf0]  ;;  %v1843_v29 = vor.u32 %v1983_v17, %v1840_v18 }
  0xd3   : > { %1440 = vst.msk [vmem:[%s2261_s29 + $0x8c] sm:$0xf] %vm1404_vm3, %v1375_v26  ;;  %v1822_v26 = vld [vmem:[%s2124_s7 + $0x1c0] sm:$0xf]  ;;  %v1695_v33 = vor.u32 %v1948_v23, %v1694_v21 }
  0xd4   : > { %1409 = vst.msk [vmem:[%s2261_s29 + $0x10] sm:$0xf] %vm1404_vm3, %v1344_v30  ;;  %v1149_v38 = vmul.f32 %v2242_v5, %v993_v31  ;;  %v1248_v39 = vadd.f32 %v2248_v10, %v1180_v34 }
  0xd5   : > { %v2331_v43 = vpop.f32.mrf.mxu3 }
  0xd6   : > { %v1217_v44 = vadd.f32 %v2248_v10, %v1149_v38  ;;  %v1312_v49 = vmax.f32 %v1248_v39, 0.0  ;;  %v1823_v38 = vor.u32 %v1980_v27, %v1822_v26 }
  0xd7   : > { %v1000_v45 = vpop.f32.mrf.mxu1  ;;  %v903_v51 = vpop.f32.mrf.mxu2 }
  0xd8   : > { %v1281_v50 = vmax.f32 %v1217_v44, 0.0  ;;  %v1376_v53 = vpack.c.bf16 %v1312_v49, %v1312_v49  ;;  %v1073_v54 = vadd.f32 %v2272_v28, %v903_v51 }
  0xd9   : > { %v826_v56 = vpop.f32.mrf.mxu0 }
  0xda   : > { %1900 = vmatmul.msk.bf16.gmra.mxu1 %vm698_vm2, %v1699_v12  ;;  %v1345_v58 = vpack.c.bf16 %v1281_v50, %v1281_v50  ;;  %v996_v59 = vadd.f32 %v995_v63, %v826_v56  ;;  %1917 = vmatmul.msk.bf16.gmra.mxu3 %vm698_vm2, %v1835_v48  ;;  %1441 = vst.msk [vmem:[%s2261_s29 + $0x90] sm:$0xf] %vm1404_vm3, %v1376_v53  ;;  %v1951_v56 = vld [vmem:[%s2124_s7 + $0xe4] sm:$0xf] }
  0xdb   : > { %v1181_v60 = vmul.f32 %v2242_v5, %v1073_v54 }
  0xdc   : > { %1410 = vst.msk [vmem:[%s2261_s29 + $0x14] sm:$0xf] %vm1404_vm3, %v1345_v58  ;;  %v1150_v55 = vmul.f32 %v2242_v5, %v996_v59  ;;  %865 = vmatmul.bf16.gmra.mxu0 %v1687_v52  ;;  %945 = vmatmul.bf16.gmra.mxu2 %v1815_v57  ;;  %v1712_v57 = vld [vmem:[%s2124_s7 + $0xe8] sm:$0xf0]  ;;  %v1985_v59 = vld [vmem:[%s2124_s7 + $0x1f4] sm:$0xf] }
  0xdd   : > { %v1249_v28 = vadd.f32 %v2248_v10, %v1181_v60  ;;  %v2346_v62 = vpop.f32.mrf.mxu3  ;;  %v1848_v60 = vld [vmem:[%s2124_s7 + $0x1f8] sm:$0xf0] }
  0xde   : > { %v1218_v63 = vadd.f32 %v2248_v10, %v1150_v55 }
  0xdf   : > { %v1002_v1 = vpop.f32.mrf.mxu1  ;;  %v1313_v2 = vmax.f32 %v1249_v28, 0.0  ;;  %v906_v4 = vpop.f32.mrf.mxu2 }
  0xe0   : > { %v1282_v3 = vmax.f32 %v1218_v63, 0.0  ;;  %v1076_v7 = vadd.f32 %v2284_v42, %v906_v4  ;;  %v1707_v42 = vor.u32 %v1949_v13, %v1704_v14  ;;  %v1702_v63 = vld [vmem:[%s2124_s7 + $0xd0] sm:$0xf] }
  0xe1   : > { %v1377_v6 = vpack.c.bf16 %v1313_v2, %v1313_v2  ;;  %v828_v8 = vpop.f32.mrf.mxu0  ;;  %v1950_v2 = vld [vmem:[%s2124_s7 + $0xd4] sm:$0xf0] }
  0xe2   : > { %v1346_v9 = vpack.c.bf16 %v1282_v3, %v1282_v3  ;;  %v998_v11 = vadd.f32 %v997_v22, %v828_v8  ;;  %v1182_v15 = vmul.f32 %v2242_v5, %v1076_v7  ;;  %v1982_v7 = vld [vmem:[%s2124_s7 + $0x1d4] sm:$0xf0]  ;;  %v1851_v8 = vor.u32 %v1985_v59, %v1848_v60 }
  0xe3   : > { %1442 = vst.msk [vmem:[%s2261_s29 + $0x94] sm:$0xf] %vm1404_vm3, %v1377_v6  ;;  %v1830_v6 = vld [vmem:[%s2124_s7 + $0x1d0] sm:$0xf]  ;;  %v1703_v14 = vor.u32 %v1950_v2, %v1702_v63 }
  0xe4   : > { %1411 = vst.msk [vmem:[%s2261_s29 + $0x18] sm:$0xf] %vm1404_vm3, %v1346_v9  ;;  %v1151_v19 = vmul.f32 %v2242_v5, %v998_v11  ;;  %v1250_v0 = vadd.f32 %v2248_v10, %v1182_v15 }
  0xe5   : > { %v2363_v22 = vpop.f32.mrf.mxu3 }
  0xe6   : > { %v1219_v24 = vadd.f32 %v2248_v10, %v1151_v19  ;;  %v1314_v30 = vmax.f32 %v1250_v0, 0.0  ;;  %v1831_v19 = vor.u32 %v1982_v7, %v1830_v6 }
  0xe7   : > { %v1005_v25 = vpop.f32.mrf.mxu1  ;;  %v908_v32 = vpop.f32.mrf.mxu2 }
  0xe8   : > { %v1283_v31 = vmax.f32 %v1219_v24, 0.0  ;;  %v1378_v34 = vpack.c.bf16 %v1314_v30, %v1314_v30  ;;  %v1078_v36 = vadd.f32 %v2299_v61, %v908_v32 }
  0xe9   : > { %v831_v37 = vpop.f32.mrf.mxu0 }
  0xea   : > { %1901 = vmatmul.msk.bf16.gmra.mxu1 %vm698_vm2, %v1707_v42  ;;  %v1347_v39 = vpack.c.bf16 %v1283_v31, %v1283_v31  ;;  %v1001_v12 = vadd.f32 %v1000_v45, %v831_v37  ;;  %1918 = vmatmul.msk.bf16.gmra.mxu3 %vm698_vm2, %v1843_v29  ;;  %1443 = vst.msk [vmem:[%s2261_s29 + $0x98] sm:$0xf] %vm1404_vm3, %v1378_v34  ;;  %v1953_v37 = vld [vmem:[%s2124_s7 + $0xf4] sm:$0xf] }
  0xeb   : > { %v1183_v40 = vmul.f32 %v2242_v5, %v1078_v36 }
  0xec   : > { %1412 = vst.msk [vmem:[%s2261_s29 + $0x1c] sm:$0xf] %vm1404_vm3, %v1347_v39  ;;  %v1152_v41 = vmul.f32 %v2242_v5, %v1001_v12  ;;  %870 = vmatmul.bf16.gmra.mxu0 %v1695_v33  ;;  %950 = vmatmul.bf16.gmra.mxu2 %v1823_v38  ;;  %v1720_v38 = vld [vmem:[%s2124_s7 + $0xf8] sm:$0xf0] }
  0xed   : > { %v1251_v61 = vadd.f32 %v2248_v10, %v1183_v40  ;;  %v2378_v44 = vpop.f32.mrf.mxu3 }
  0xee   : > { %v1220_v45 = vadd.f32 %v2248_v10, %v1152_v41  ;;  %v1723_v41 = vor.u32 %v1953_v37, %v1720_v38 }
  0xef   : > { %v1007_v46 = vpop.f32.mrf.mxu1  ;;  %v1315_v47 = vmax.f32 %v1251_v61, 0.0  ;;  %v911_v49 = vpop.f32.mrf.mxu2  ;;  %v1710_v61 = vld [vmem:[%s2124_s7 + $0xe0] sm:$0xf] }
  0xf0   : > { %v1284_v48 = vmax.f32 %v1220_v45, 0.0  ;;  %v1081_v51 = vadd.f32 %v2314_v20, %v911_v49  ;;  %v1715_v20 = vor.u32 %v1951_v56, %v1712_v57 }
  0xf1   : > { %v1379_v50 = vpack.c.bf16 %v1315_v47, %v1315_v47  ;;  %v833_v52 = vpop.f32.mrf.mxu0 }
  0xf2   : > { %v1348_v53 = vpack.c.bf16 %v1284_v48, %v1284_v48  ;;  %v1003_v54 = vadd.f32 %v1002_v1, %v833_v52  ;;  %v1184_v58 = vmul.f32 %v2242_v5, %v1081_v51  ;;  %v1984_v48 = vld [vmem:[%s2124_s7 + $0x1e4] sm:$0xf0] }
  0xf3   : > { %1444 = vst.msk [vmem:[%s2261_s29 + $0x9c] sm:$0xf] %vm1404_vm3, %v1379_v50 }
  0xf4   : > { %1413 = vst.msk [vmem:[%s2261_s29 + $0x20] sm:$0xf] %vm1404_vm3, %v1348_v53  ;;  %v1153_v55 = vmul.f32 %v2242_v5, %v1003_v54  ;;  %v1252_v28 = vadd.f32 %v2248_v10, %v1184_v58 }
  0xf5   : > { %v2395_v1 = vpop.f32.mrf.mxu3 }
  0xf6   : > { %v1221_v3 = vadd.f32 %v2248_v10, %v1153_v55  ;;  %v1316_v9 = vmax.f32 %v1252_v28, 0.0 }
  0xf7   : > { %v1010_v4 = vpop.f32.mrf.mxu1  ;;  %v913_v13 = vpop.f32.mrf.mxu2 }
  0xf8   : > { %v1285_v11 = vmax.f32 %v1221_v3, 0.0  ;;  %v1380_v15 = vpack.c.bf16 %v1316_v9, %v1316_v9  ;;  %v1083_v17 = vadd.f32 %v2331_v43, %v913_v13  ;;  %v1955_v13 = vld [vmem:[%s2124_s7 + $0x104] sm:$0xf] }
  0xf9   : > { %v836_v18 = vpop.f32.mrf.mxu0 }
  0xfa   : > { %1902 = vmatmul.msk.bf16.gmra.mxu1 %vm698_vm2, %v1715_v20  ;;  %v1349_v0 = vpack.c.bf16 %v1285_v11, %v1285_v11  ;;  %v1006_v42 = vadd.f32 %v1005_v25, %v836_v18  ;;  %1919 = vmatmul.msk.bf16.gmra.mxu3 %vm698_vm2, %v1851_v8  ;;  %1445 = vst.msk [vmem:[%s2261_s29 + $0xa0] sm:$0xf] %vm1404_vm3, %v1380_v15 }
  0xfb   : > { %v1185_v21 = vmul.f32 %v2242_v5, %v1083_v17 }
  0xfc   : > { %1414 = vst.msk [vmem:[%s2261_s29 + $0x24] sm:$0xf] %vm1404_vm3, %v1349_v0  ;;  %v1154_v23 = vmul.f32 %v2242_v5, %v1006_v42  ;;  %875 = vmatmul.bf16.gmra.mxu0 %v1703_v14  ;;  %955 = vmatmul.bf16.gmra.mxu2 %v1831_v19  ;;  %v1728_v14 = vld [vmem:[%s2124_s7 + $0x108] sm:$0xf0]  ;;  %v1718_v0 = vld [vmem:[%s2124_s7 + $0xf0] sm:$0xf] }
  0xfd   : > { %v1253_v43 = vadd.f32 %v2248_v10, %v1185_v21  ;;  %v2411_v26 = vpop.f32.mrf.mxu3  ;;  %v1954_v42 = vld [vmem:[%s2124_s7 + $0xf4] sm:$0xf0] }
  0xfe   : > { %v1222_v24 = vadd.f32 %v2248_v10, %v1154_v23 }
  0xff   : > { %v1012_v25 = vpop.f32.mrf.mxu1  ;;  %v1317_v27 = vmax.f32 %v1253_v43, 0.0  ;;  %v916_v30 = vpop.f32.mrf.mxu2  ;;  %v1846_v43 = vld [vmem:[%s2124_s7 + $0x1f0] sm:$0xf] }
 0x100   : > { %v1286_v29 = vmax.f32 %v1222_v24, 0.0  ;;  %v1086_v32 = vadd.f32 %v2346_v62, %v916_v30  ;;  %v1952_v62 = vld [vmem:[%s2124_s7 + $0xe4] sm:$0xf0]  ;;  %v1986_v24 = vld [vmem:[%s2124_s7 + $0x1f4] sm:$0xf0]  ;;  %v1719_v30 = vor.u32 %v1954_v42, %v1718_v0 }
 0x101   : > { %v1381_v31 = vpack.c.bf16 %v1317_v27, %v1317_v27  ;;  %v838_v33 = vpop.f32.mrf.mxu0  ;;  %v1711_v52 = vor.u32 %v1952_v62, %v1710_v61 }
 0x102   : > { %v1350_v34 = vpack.c.bf16 %v1286_v29, %v1286_v29  ;;  %v1008_v36 = vadd.f32 %v1007_v46, %v838_v33  ;;  %v1186_v39 = vmul.f32 %v2242_v5, %v1086_v32  ;;  %v1838_v46 = vld [vmem:[%s2124_s7 + $0x1e0] sm:$0xf] }
 0x103   : > { %1446 = vst.msk [vmem:[%s2261_s29 + $0xa4] sm:$0xf] %vm1404_vm3, %v1381_v31  ;;  %v1839_v58 = vor.u32 %v1984_v48, %v1838_v46 }
 0x104   : > { %1415 = vst.msk [vmem:[%s2261_s29 + $0x28] sm:$0xf] %vm1404_vm3, %v1350_v34  ;;  %v1155_v12 = vmul.f32 %v2242_v5, %v1008_v36  ;;  %v1254_v40 = vadd.f32 %v2248_v10, %v1186_v39  ;;  %v1847_v34 = vor.u32 %v1986_v24, %v1846_v43 }
 0x105   : > { %v2428_v53 = vpop.f32.mrf.mxu3 }
 0x106   : > { %v1223_v45 = vadd.f32 %v2248_v10, %v1155_v12  ;;  %v1318_v49 = vmax.f32 %v1254_v40, 0.0 }
 0x107   : > { %v1015_v47 = vpop.f32.mrf.mxu1  ;;  %v918_v51 = vpop.f32.mrf.mxu2 }
 0x108   : > { %v1287_v50 = vmax.f32 %v1223_v45, 0.0  ;;  %v1382_v54 = vpack.c.bf16 %v1318_v49, %v1318_v49  ;;  %v1088_v56 = vadd.f32 %v2363_v22, %v918_v51 }
 0x109   : > { %v841_v57 = vpop.f32.mrf.mxu0 }
 0x10a   : > { %1903 = vmatmul.msk.bf16.gmra.mxu1 %vm698_vm2, %v1723_v41  ;;  %v1351_v59 = vpack.c.bf16 %v1287_v50, %v1287_v50  ;;  %v1011_v60 = vadd.f32 %v1010_v4, %v841_v57  ;;  %1447 = vst.msk [vmem:[%s2261_s29 + $0xa8] sm:$0xf] %vm1404_vm3, %v1382_v54  ;;  %v1187_v55 = vmul.f32 %v2242_v5, %v1088_v56 }
 0x10c   : > { %1416 = vst.msk [vmem:[%s2261_s29 + $0x2c] sm:$0xf] %vm1404_vm3, %v1351_v59  ;;  %v1156_v28 = vmul.f32 %v2242_v5, %v1011_v60  ;;  %880 = vmatmul.bf16.gmra.mxu0 %v1711_v52  ;;  %v1255_v22 = vadd.f32 %v2248_v10, %v1187_v55  ;;  %960 = vmatmul.bf16.gmra.mxu2 %v1839_v58 }
 0x10d   : > { %v2443_v15 = vpop.f32.mrf.mxu3 }
 0x10e   : > { %v1224_v20 = vadd.f32 %v2248_v10, %v1156_v28  ;;  %v1319_v2 = vmax.f32 %v1255_v22, 0.0 }
 0x10f   : > { %v1017_v63 = vpop.f32.mrf.mxu1  ;;  %v921_v4 = vpop.f32.mrf.mxu2 }
 0x110   : > { %v1288_v3 = vmax.f32 %v1224_v20, 0.0  ;;  %v1383_v6 = vpack.c.bf16 %v1319_v2, %v1319_v2  ;;  %v1091_v7 = vadd.f32 %v2378_v44, %v921_v4  ;;  %v1731_v44 = vor.u32 %v1955_v13, %v1728_v14 }
 0x111   : > { %v843_v8 = vpop.f32.mrf.mxu0 }
 0x112   : > { %v1352_v9 = vpack.c.bf16 %v1288_v3, %v1288_v3  ;;  %v1013_v11 = vadd.f32 %v1012_v25, %v843_v8  ;;  %1448 = vst.msk [vmem:[%s2261_s29 + $0xac] sm:$0xf] %vm1404_vm3, %v1383_v6  ;;  %v1188_v17 = vmul.f32 %v2242_v5, %v1091_v7 }
 0x114   : > { %1417 = vst.msk [vmem:[%s2261_s29 + $0x30] sm:$0xf] %vm1404_vm3, %v1352_v9  ;;  %v1157_v18 = vmul.f32 %v2242_v5, %v1013_v11  ;;  %v1256_v19 = vadd.f32 %v2248_v10, %v1188_v17 }
 0x115   : > { %v1102_v12 = vpop.f32.mrf.mxu3 }
 0x116   : > { %v1225_v21 = vadd.f32 %v2248_v10, %v1157_v18  ;;  %v1320_v25 = vmax.f32 %v1256_v19, 0.0 }
 0x117   : > { %v1020_v23 = vpop.f32.mrf.mxu1  ;;  %v923_v29 = vpop.f32.mrf.mxu2 }
 0x118   : > { %v1289_v27 = vmax.f32 %v1225_v21, 0.0  ;;  %v1384_v31 = vpack.c.bf16 %v1320_v25, %v1320_v25  ;;  %v1093_v32 = vadd.f32 %v2395_v1, %v923_v29 }
 0x119   : > { %v846_v33 = vpop.f32.mrf.mxu0 }
 0x11a   : > { %1904 = vmatmul.msk.bf16.gmra.mxu1 %vm698_vm2, %v1731_v44  ;;  %v1353_v36 = vpack.c.bf16 %v1289_v27, %v1289_v27  ;;  %v1016_v37 = vadd.f32 %v1015_v47, %v846_v33  ;;  %1449 = vst.msk [vmem:[%s2261_s29 + $0xb0] sm:$0xf] %vm1404_vm3, %v1384_v31  ;;  %v1189_v38 = vmul.f32 %v2242_v5, %v1093_v32 }
 0x11c   : > { %1418 = vst.msk [vmem:[%s2261_s29 + $0x34] sm:$0xf] %vm1404_vm3, %v1353_v36  ;;  %v1158_v39 = vmul.f32 %v2242_v5, %v1016_v37  ;;  %885 = vmatmul.bf16.gmra.mxu0 %v1719_v30  ;;  %v1257_v1 = vadd.f32 %v2248_v10, %v1189_v38  ;;  %965 = vmatmul.bf16.gmra.mxu2 %v1847_v34 }
 0x11d   : > { %v1105_v58 = vpop.f32.mrf.mxu3 }
 0x11e   : > { %v1226_v40 = vadd.f32 %v2248_v10, %v1158_v39  ;;  %v1321_v61 = vmax.f32 %v1257_v1, 0.0 }
 0x11f   : > { %v1022_v41 = vpop.f32.mrf.mxu1  ;;  %v926_v45 = vpop.f32.mrf.mxu2 }
 0x120   : > { %v1290_v62 = vmax.f32 %v1226_v40, 0.0  ;;  %v1385_v47 = vpack.c.bf16 %v1321_v61, %v1321_v61  ;;  %v1096_v46 = vadd.f32 %v2411_v26, %v926_v45 }
 0x121   : > { %v848_v48 = vpop.f32.mrf.mxu0 }
 0x122   : > { %v1354_v49 = vpack.c.bf16 %v1290_v62, %v1290_v62  ;;  %v1018_v50 = vadd.f32 %v1017_v63, %v848_v48  ;;  %1450 = vst.msk [vmem:[%s2261_s29 + $0xb4] sm:$0xf] %vm1404_vm3, %v1385_v47  ;;  %v1190_v51 = vmul.f32 %v2242_v5, %v1096_v46 }
 0x124   : > { %1419 = vst.msk [vmem:[%s2261_s29 + $0x38] sm:$0xf] %vm1404_vm3, %v1354_v49  ;;  %v1159_v52 = vmul.f32 %v2242_v5, %v1018_v50  ;;  %v1258_v54 = vadd.f32 %v2248_v10, %v1190_v51 }
 0x125   : > { %v1107_v11 = vpop.f32.mrf.mxu3 }
 0x126   : > { %v1227_v56 = vadd.f32 %v2248_v10, %v1159_v52  ;;  %v1322_v26 = vmax.f32 %v1258_v54, 0.0 }
 0x127   : > { %v1025_v57 = vpop.f32.mrf.mxu1  ;;  %v928_v60 = vpop.f32.mrf.mxu2 }
 0x128   : > { %v1291_v59 = vmax.f32 %v1227_v56, 0.0  ;;  %v1386_v55 = vpack.c.bf16 %v1322_v26, %v1322_v26  ;;  %v1098_v28 = vadd.f32 %v2428_v53, %v928_v60 }
 0x129   : > { %v851_v22 = vpop.f32.mrf.mxu0 }
 0x12a   : > { %v1355_v20 = vpack.c.bf16 %v1291_v59, %v1291_v59  ;;  %v1021_v63 = vadd.f32 %v1020_v23, %v851_v22  ;;  %1451 = vst.msk [vmem:[%s2261_s29 + $0xb8] sm:$0xf] %vm1404_vm3, %v1386_v55  ;;  %v1191_v2 = vmul.f32 %v2242_v5, %v1098_v28 }
 0x12c   : > { %1420 = vst.msk [vmem:[%s2261_s29 + $0x3c] sm:$0xf] %vm1404_vm3, %v1355_v20  ;;  %v1160_v3 = vmul.f32 %v2242_v5, %v1021_v63  ;;  %v1259_v4 = vadd.f32 %v2248_v10, %v1191_v2 }
 0x12d   : > { %v1110_v32 = vpop.f32.mrf.mxu3 }
 0x12e   : > { %v1228_v6 = vadd.f32 %v2248_v10, %v1160_v3  ;;  %v1323_v8 = vmax.f32 %v1259_v4, 0.0 }
 0x12f   : > { %v1027_v7 = vpop.f32.mrf.mxu1  ;;  %v931_v9 = vpop.f32.mrf.mxu2 }
 0x130   : > { %v1292_v53 = vmax.f32 %v1228_v6, 0.0  ;;  %v1387_v13 = vpack.c.bf16 %v1323_v8, %v1323_v8  ;;  %v1101_v14 = vadd.f32 %v2443_v15, %v931_v9 }
 0x131   : > { %v853_v17 = vpop.f32.mrf.mxu0 }
 0x132   : > { %v1356_v18 = vpack.c.bf16 %v1292_v53, %v1292_v53  ;;  %v1023_v19 = vadd.f32 %v1022_v41, %v853_v17  ;;  %1452 = vst.msk [vmem:[%s2261_s29 + $0xbc] sm:$0xf] %vm1404_vm3, %v1387_v13  ;;  %v1192_v44 = vmul.f32 %v2242_v5, %v1101_v14 }
 0x134   : > { %1421 = vst.msk [vmem:[%s2261_s29 + $0x40] sm:$0xf] %vm1404_vm3, %v1356_v18  ;;  %v1161_v0 = vmul.f32 %v2242_v5, %v1023_v19  ;;  %v1260_v42 = vadd.f32 %v2248_v10, %v1192_v44 }
 0x135   : > { %v1112_v48 = vpop.f32.mrf.mxu3 }
 0x136   : > { %v1229_v21 = vadd.f32 %v2248_v10, %v1161_v0  ;;  %v1324_v43 = vmax.f32 %v1260_v42, 0.0 }
 0x137   : > { %v1030_v23 = vpop.f32.mrf.mxu1  ;;  %v933_v24 = vpop.f32.mrf.mxu2 }
 0x138   : > { %v1293_v15 = vmax.f32 %v1229_v21, 0.0  ;;  %v1388_v25 = vpack.c.bf16 %v1324_v43, %v1324_v43  ;;  %v1103_v27 = vadd.f32 %v1102_v12, %v933_v24 }
 0x139   : > { %v856_v29 = vpop.f32.mrf.mxu0 }
 0x13a   : > { %v1357_v30 = vpack.c.bf16 %v1293_v15, %v1293_v15  ;;  %v1026_v31 = vadd.f32 %v1025_v57, %v856_v29  ;;  %1453 = vst.msk [vmem:[%s2261_s29 + $0xc0] sm:$0xf] %vm1404_vm3, %v1388_v25  ;;  %v1193_v33 = vmul.f32 %v2242_v5, %v1103_v27 }
 0x13c   : > { %1422 = vst.msk [vmem:[%s2261_s29 + $0x44] sm:$0xf] %vm1404_vm3, %v1357_v30  ;;  %v1162_v34 = vmul.f32 %v2242_v5, %v1026_v31  ;;  %v1261_v36 = vadd.f32 %v2248_v10, %v1193_v33 }
 0x13d   : > { %v1115_v2 = vpop.f32.mrf.mxu3 }
 0x13e   : > { %v1230_v37 = vadd.f32 %v2248_v10, %v1162_v34  ;;  %v1325_v39 = vmax.f32 %v1261_v36, 0.0 }
 0x13f   : > { %v1032_v38 = vpop.f32.mrf.mxu1  ;;  %v936_v1 = vpop.f32.mrf.mxu2 }
 0x140   : > { %v1294_v12 = vmax.f32 %v1230_v37, 0.0  ;;  %v1389_v40 = vpack.c.bf16 %v1325_v39, %v1325_v39  ;;  %v1106_v41 = vadd.f32 %v1105_v58, %v936_v1 }
 0x141   : > { %v858_v61 = vpop.f32.mrf.mxu0 }
 0x142   : > { %v1358_v62 = vpack.c.bf16 %v1294_v12, %v1294_v12  ;;  %v1028_v45 = vadd.f32 %v1027_v7, %v858_v61  ;;  %1454 = vst.msk [vmem:[%s2261_s29 + $0xc4] sm:$0xf] %vm1404_vm3, %v1389_v40  ;;  %v1194_v47 = vmul.f32 %v2242_v5, %v1106_v41 }
 0x144   : > { %1423 = vst.msk [vmem:[%s2261_s29 + $0x48] sm:$0xf] %vm1404_vm3, %v1358_v62  ;;  %v1163_v46 = vmul.f32 %v2242_v5, %v1028_v45  ;;  %v1262_v49 = vadd.f32 %v2248_v10, %v1194_v47 }
 0x145   : > { %v1117_v21 = vpop.f32.mrf.mxu3 }
 0x146   : > { %v1231_v50 = vadd.f32 %v2248_v10, %v1163_v46  ;;  %v1326_v52 = vmax.f32 %v1262_v49, 0.0 }
 0x147   : > { %v1035_v51 = vpop.f32.mrf.mxu1  ;;  %v938_v56 = vpop.f32.mrf.mxu2 }
 0x148   : > { %v1295_v54 = vmax.f32 %v1231_v50, 0.0  ;;  %v1390_v57 = vpack.c.bf16 %v1326_v52, %v1326_v52  ;;  %v1108_v58 = vadd.f32 %v1107_v11, %v938_v56 }
 0x149   : > { %v861_v26 = vpop.f32.mrf.mxu0 }
 0x14a   : > { %v1359_v59 = vpack.c.bf16 %v1295_v54, %v1295_v54  ;;  %v1031_v60 = vadd.f32 %v1030_v23, %v861_v26  ;;  %1455 = vst.msk [vmem:[%s2261_s29 + $0xc8] sm:$0xf] %vm1404_vm3, %v1390_v57  ;;  %v1195_v55 = vmul.f32 %v2242_v5, %v1108_v58 }
 0x14c   : > { %1424 = vst.msk [vmem:[%s2261_s29 + $0x4c] sm:$0xf] %vm1404_vm3, %v1359_v59  ;;  %v1164_v28 = vmul.f32 %v2242_v5, %v1031_v60  ;;  %v1263_v22 = vadd.f32 %v2248_v10, %v1195_v55 }
 0x14d   : > { %v1120_v40 = vpop.f32.mrf.mxu3 }
 0x14e   : > { %v1232_v20 = vadd.f32 %v2248_v10, %v1164_v28  ;;  %v1327_v3 = vmax.f32 %v1263_v22, 0.0 }
 0x14f   : > { %v1037_v63 = vpop.f32.mrf.mxu1  ;;  %v941_v6 = vpop.f32.mrf.mxu2 }
 0x150   : > { %v1296_v4 = vmax.f32 %v1232_v20, 0.0  ;;  %v1391_v7 = vpack.c.bf16 %v1327_v3, %v1327_v3  ;;  %v1111_v8 = vadd.f32 %v1110_v32, %v941_v6 }
 0x151   : > { %v863_v53 = vpop.f32.mrf.mxu0 }
 0x152   : > { %v1360_v9 = vpack.c.bf16 %v1296_v4, %v1296_v4  ;;  %v1033_v11 = vadd.f32 %v1032_v38, %v863_v53  ;;  %1456 = vst.msk [vmem:[%s2261_s29 + $0xcc] sm:$0xf] %vm1404_vm3, %v1391_v7  ;;  %v1196_v13 = vmul.f32 %v2242_v5, %v1111_v8 }
 0x154   : > { %1425 = vst.msk [vmem:[%s2261_s29 + $0x50] sm:$0xf] %vm1404_vm3, %v1360_v9  ;;  %v1165_v14 = vmul.f32 %v2242_v5, %v1033_v11  ;;  %v1264_v17 = vadd.f32 %v2248_v10, %v1196_v13 }
 0x155   : > { %v1122_v26 = vpop.f32.mrf.mxu3 }
 0x156   : > { %v1233_v18 = vadd.f32 %v2248_v10, %v1165_v14  ;;  %v1328_v44 = vmax.f32 %v1264_v17, 0.0 }
 0x157   : > { %v1040_v19 = vpop.f32.mrf.mxu1  ;;  %v943_v42 = vpop.f32.mrf.mxu2 }
 0x158   : > { %v1297_v0 = vmax.f32 %v1233_v18, 0.0  ;;  %v1392_v23 = vpack.c.bf16 %v1328_v44, %v1328_v44  ;;  %v1113_v43 = vadd.f32 %v1112_v48, %v943_v42 }
 0x159   : > { %v866_v15 = vpop.f32.mrf.mxu0 }
 0x15a   : > { %v1361_v24 = vpack.c.bf16 %v1297_v0, %v1297_v0  ;;  %v1036_v25 = vadd.f32 %v1035_v51, %v866_v15  ;;  %1457 = vst.msk [vmem:[%s2261_s29 + $0xd0] sm:$0xf] %vm1404_vm3, %v1392_v23  ;;  %v1197_v27 = vmul.f32 %v2242_v5, %v1113_v43 }
 0x15c   : > { %1426 = vst.msk [vmem:[%s2261_s29 + $0x54] sm:$0xf] %vm1404_vm3, %v1361_v24  ;;  %v1166_v29 = vmul.f32 %v2242_v5, %v1036_v25  ;;  %v1265_v30 = vadd.f32 %v2248_v10, %v1197_v27 }
 0x15d   : > { %v1125_v13 = vpop.f32.mrf.mxu3 }
 0x15e   : > { %v1234_v31 = vadd.f32 %v2248_v10, %v1166_v29  ;;  %v1329_v33 = vmax.f32 %v1265_v30, 0.0 }
 0x15f   : > { %v1042_v32 = vpop.f32.mrf.mxu1  ;;  %v946_v36 = vpop.f32.mrf.mxu2 }
 0x160   : > { %v1298_v34 = vmax.f32 %v1234_v31, 0.0  ;;  %v1393_v37 = vpack.c.bf16 %v1329_v33, %v1329_v33  ;;  %v1116_v38 = vadd.f32 %v1115_v2, %v946_v36 }
 0x161   : > { %v868_v39 = vpop.f32.mrf.mxu0 }
 0x162   : > { %v1362_v12 = vpack.c.bf16 %v1298_v34, %v1298_v34  ;;  %v1038_v1 = vadd.f32 %v1037_v63, %v868_v39  ;;  %1458 = vst.msk [vmem:[%s2261_s29 + $0xd4] sm:$0xf] %vm1404_vm3, %v1393_v37  ;;  %v1198_v41 = vmul.f32 %v2242_v5, %v1116_v38 }
 0x164   : > { %1427 = vst.msk [vmem:[%s2261_s29 + $0x58] sm:$0xf] %vm1404_vm3, %v1362_v12  ;;  %v1167_v61 = vmul.f32 %v2242_v5, %v1038_v1  ;;  %v1266_v62 = vadd.f32 %v2248_v10, %v1198_v41 }
 0x165   : > { %v1127_v31 = vpop.f32.mrf.mxu3 }
 0x166   : > { %v1235_v45 = vadd.f32 %v2248_v10, %v1167_v61  ;;  %v1330_v46 = vmax.f32 %v1266_v62, 0.0 }
 0x167   : > { %v1045_v47 = vpop.f32.mrf.mxu1  ;;  %v948_v49 = vpop.f32.mrf.mxu2 }
 0x168   : > { %v1299_v48 = vmax.f32 %v1235_v45, 0.0  ;;  %v1394_v50 = vpack.c.bf16 %v1330_v46, %v1330_v46  ;;  %v1118_v51 = vadd.f32 %v1117_v21, %v948_v49 }
 0x169   : > { %v871_v52 = vpop.f32.mrf.mxu0 }
 0x16a   : > { %v1363_v54 = vpack.c.bf16 %v1299_v48, %v1299_v48  ;;  %v1041_v56 = vadd.f32 %v1040_v19, %v871_v52  ;;  %1459 = vst.msk [vmem:[%s2261_s29 + $0xd8] sm:$0xf] %vm1404_vm3, %v1394_v50  ;;  %v1199_v57 = vmul.f32 %v2242_v5, %v1118_v51 }
 0x16c   : > { %1428 = vst.msk [vmem:[%s2261_s29 + $0x5c] sm:$0xf] %vm1404_vm3, %v1363_v54  ;;  %v1168_v58 = vmul.f32 %v2242_v5, %v1041_v56  ;;  %v1267_v59 = vadd.f32 %v2248_v10, %v1199_v57 }
 0x16d   : > { %v1130_v49 = vpop.f32.mrf.mxu3 }
 0x16e   : > { %v1236_v60 = vadd.f32 %v2248_v10, %v1168_v58  ;;  %v1331_v28 = vmax.f32 %v1267_v59, 0.0 }
 0x16f   : > { %v1047_v55 = vpop.f32.mrf.mxu1  ;;  %v951_v20 = vpop.f32.mrf.mxu2 }
 0x170   : > { %v1300_v22 = vmax.f32 %v1236_v60, 0.0  ;;  %v1395_v63 = vpack.c.bf16 %v1331_v28, %v1331_v28  ;;  %v1121_v2 = vadd.f32 %v1120_v40, %v951_v20 }
 0x171   : > { %v873_v3 = vpop.f32.mrf.mxu0 }
 0x172   : > { %v1364_v4 = vpack.c.bf16 %v1300_v22, %v1300_v22  ;;  %v1043_v6 = vadd.f32 %v1042_v32, %v873_v3  ;;  %1460 = vst.msk [vmem:[%s2261_s29 + $0xdc] sm:$0xf] %vm1404_vm3, %v1395_v63  ;;  %v1200_v7 = vmul.f32 %v2242_v5, %v1121_v2 }
 0x174   : > { %1429 = vst.msk [vmem:[%s2261_s29 + $0x60] sm:$0xf] %vm1404_vm3, %v1364_v4  ;;  %v1169_v8 = vmul.f32 %v2242_v5, %v1043_v6  ;;  %v1268_v53 = vadd.f32 %v2248_v10, %v1200_v7  ;;  %v2563_v5 = vld [vmem:[%s2645_s2] ss:$0 sm:$0xff] }
 0x175   : > { %v1132_v2 = vpop.f32.mrf.mxu3 }
 0x176   : > { %v1237_v9 = vadd.f32 %v2248_v10, %v1169_v8  ;;  %v1332_v14 = vmax.f32 %v1268_v53, 0.0 }
 0x177   : > { %v1050_v11 = vpop.f32.mrf.mxu1  ;;  %v953_v18 = vpop.f32.mrf.mxu2 }
 0x178   : > { %v1301_v17 = vmax.f32 %v1237_v9, 0.0  ;;  %v1396_v19 = vpack.c.bf16 %v1332_v14, %v1332_v14  ;;  %v1123_v44 = vadd.f32 %v1122_v26, %v953_v18 }
 0x179   : > { %v876_v0 = vpop.f32.mrf.mxu0 }
 0x17a   : > { %v1365_v42 = vpack.c.bf16 %v1301_v17, %v1301_v17  ;;  %v1046_v21 = vadd.f32 %v1045_v47, %v876_v0  ;;  %1461 = vst.msk [vmem:[%s2261_s29 + $0xe0] sm:$0xf] %vm1404_vm3, %v1396_v19  ;;  %v1201_v23 = vmul.f32 %v2563_v5, %v1123_v44 }
 0x17c   : > { %1430 = vst.msk [vmem:[%s2261_s29 + $0x64] sm:$0xf] %vm1404_vm3, %v1365_v42  ;;  %v1170_v43 = vmul.f32 %v2563_v5, %v1046_v21  ;;  %v1269_v15 = vadd.f32 %v2248_v10, %v1201_v23 }
 0x17e   : > { %v1238_v24 = vadd.f32 %v2248_v10, %v1170_v43  ;;  %v1333_v27 = vmax.f32 %v1269_v15, 0.0  ;;  %v2580_v10 = vld [vmem:[%s2646_s3] ss:$0 sm:$0xff]  ;;  %v1135_v43 = vpop.f32.mrf.mxu3 }
 0x17f   : > { %v1052_v25 = vpop.f32.mrf.mxu1  ;;  %v956_v30 = vpop.f32.mrf.mxu2 }
 0x180   : > { %v1302_v29 = vmax.f32 %v1238_v24, 0.0  ;;  %v1397_v32 = vpack.c.bf16 %v1333_v27, %v1333_v27  ;;  %v1126_v33 = vadd.f32 %v1125_v13, %v956_v30 }
 0x181   : > { %v878_v34 = vpop.f32.mrf.mxu0 }
 0x182   : > { %v1366_v36 = vpack.c.bf16 %v1302_v29, %v1302_v29  ;;  %v1048_v37 = vadd.f32 %v1047_v55, %v878_v34  ;;  %1462 = vst.msk [vmem:[%s2261_s29 + $0xe4] sm:$0xf] %vm1404_vm3, %v1397_v32  ;;  %v1202_v38 = vmul.f32 %v2563_v5, %v1126_v33 }
 0x184   : > { %1431 = vst.msk [vmem:[%s2261_s29 + $0x68] sm:$0xf] %vm1404_vm3, %v1366_v36  ;;  %v1171_v39 = vmul.f32 %v2563_v5, %v1048_v37  ;;  %v1270_v12 = vadd.f32 %v2580_v10, %v1202_v38 }
 0x186   : > { %v1239_v1 = vadd.f32 %v2580_v10, %v1171_v39  ;;  %v1334_v41 = vmax.f32 %v1270_v12, 0.0 }
 0x187   : > { %v1055_v40 = vpop.f32.mrf.mxu1  ;;  %v958_v62 = vpop.f32.mrf.mxu2 }
 0x188   : > { %v1303_v61 = vmax.f32 %v1239_v1, 0.0  ;;  %v1398_v45 = vpack.c.bf16 %v1334_v41, %v1334_v41  ;;  %v1128_v47 = vadd.f32 %v1127_v31, %v958_v62 }
 0x189   : > { %v881_v46 = vpop.f32.mrf.mxu0 }
 0x18a   : > { %v1367_v48 = vpack.c.bf16 %v1303_v61, %v1303_v61  ;;  %v1051_v50 = vadd.f32 %v1050_v11, %v881_v46  ;;  %1463 = vst.msk [vmem:[%s2261_s29 + $0xe8] sm:$0xf] %vm1404_vm3, %v1398_v45  ;;  %v1203_v51 = vmul.f32 %v2563_v5, %v1128_v47  ;;  %v1137_v45 = vpop.f32.mrf.mxu3 }
 0x18c   : > { %1432 = vst.msk [vmem:[%s2261_s29 + $0x6c] sm:$0xf] %vm1404_vm3, %v1367_v48  ;;  %v1172_v52 = vmul.f32 %v2563_v5, %v1051_v50  ;;  %v1271_v54 = vadd.f32 %v2580_v10, %v1203_v51 }
 0x18e   : > { %v1240_v56 = vadd.f32 %v2580_v10, %v1172_v52  ;;  %v1335_v58 = vmax.f32 %v1271_v54, 0.0 }
 0x18f   : > { %v1057_v57 = vpop.f32.mrf.mxu1  ;;  %v961_v59 = vpop.f32.mrf.mxu2 }
 0x190   : > { %v1304_v26 = vmax.f32 %v1240_v56, 0.0  ;;  %v1399_v60 = vpack.c.bf16 %v1335_v58, %v1335_v58  ;;  %v1131_v55 = vadd.f32 %v1130_v49, %v961_v59 }
 0x191   : > { %v883_v28 = vpop.f32.mrf.mxu0 }
 0x192   : > { %v1368_v22 = vpack.c.bf16 %v1304_v26, %v1304_v26  ;;  %v1053_v20 = vadd.f32 %v1052_v25, %v883_v28  ;;  %1464 = vst.msk [vmem:[%s2261_s29 + $0xec] sm:$0xf] %vm1404_vm3, %v1399_v60  ;;  %v1204_v63 = vmul.f32 %v2563_v5, %v1131_v55 }
 0x194   : > { %1433 = vst.msk [vmem:[%s2261_s29 + $0x70] sm:$0xf] %vm1404_vm3, %v1368_v22  ;;  %v1173_v3 = vmul.f32 %v2563_v5, %v1053_v20  ;;  %v1272_v4 = vadd.f32 %v2580_v10, %v1204_v63 }
 0x196   : > { %v1241_v6 = vadd.f32 %v2580_v10, %v1173_v3  ;;  %v1336_v8 = vmax.f32 %v1272_v4, 0.0 }
 0x197   : > { %v1060_v7 = vpop.f32.mrf.mxu1  ;;  %v963_v11 = vpop.f32.mrf.mxu2 }
 0x198   : > { %v1061_v53 = vadd.f32 %v1060_v7, %v2256_v16  ;;  %v1305_v9 = vmax.f32 %v1241_v6, 0.0  ;;  %v1400_v13 = vpack.c.bf16 %v1336_v8, %v1336_v8  ;;  %v1133_v17 = vadd.f32 %v1132_v2, %v963_v11 }
 0x199   : > { %v886_v18 = vpop.f32.mrf.mxu0 }
 0x19a   : > { %v1176_v14 = vmul.f32 %v2563_v5, %v1061_v53  ;;  %v1369_v19 = vpack.c.bf16 %v1305_v9, %v1305_v9  ;;  %v1056_v44 = vadd.f32 %v1055_v40, %v886_v18  ;;  %1465 = vst.msk [vmem:[%s2261_s29 + $0xf0] sm:$0xf] %vm1404_vm3, %v1400_v13  ;;  %v1205_v42 = vmul.f32 %v2563_v5, %v1133_v17 }
 0x19c   : > { %v1244_v0 = vadd.f32 %v2580_v10, %v1176_v14  ;;  %1434 = vst.msk [vmem:[%s2261_s29 + $0x74] sm:$0xf] %vm1404_vm3, %v1369_v19  ;;  %v1174_v16 = vmul.f32 %v2563_v5, %v1056_v44  ;;  %v1273_v23 = vadd.f32 %v2580_v10, %v1205_v42 }
 0x19e   : > { %v1308_v21 = vmax.f32 %v1244_v0, 0.0  ;;  %v1242_v15 = vadd.f32 %v2580_v10, %v1174_v16  ;;  %v1337_v27 = vmax.f32 %v1273_v23, 0.0 }
 0x19f   : > { %v1062_v24 = vpop.f32.mrf.mxu1  ;;  %v966_v31 = vpop.f32.mrf.mxu2 }
 0x1a0   : > { %v1372_v25 = vpack.c.bf16 %v1308_v21, %v1308_v21  ;;  %v1063_v29 = vadd.f32 %v1062_v24, %v2277_v35  ;;  %v1306_v30 = vmax.f32 %v1242_v15, 0.0  ;;  %v1401_v32 = vpack.c.bf16 %v1337_v27, %v1337_v27 }
 0x1a1   : > { %v1136_v34 = vadd.f32 %v1135_v43, %v966_v31  ;;  %v888_v36 = vpop.f32.mrf.mxu0 }
 0x1a2   : > { %1437 = vst.msk [vmem:[%s2261_s29 + $0x80] sm:$0xf] %vm1404_vm3, %v1372_v25  ;;  %v1177_v33 = vmul.f32 %v2563_v5, %v1063_v29  ;;  %v1370_v37 = vpack.c.bf16 %v1306_v30, %v1306_v30  ;;  %v1058_v38 = vadd.f32 %v1057_v57, %v888_v36 }
 0x1a3   : > { %1466 = vst.msk [vmem:[%s2261_s29 + $0xf4] sm:$0xf] %vm1404_vm3, %v1401_v32  ;;  %v1206_v12 = vmul.f32 %v2563_v5, %v1136_v34 }
 0x1a4   : > { %v1245_v39 = vadd.f32 %v2580_v10, %v1177_v33  ;;  %1435 = vst.msk [vmem:[%s2261_s29 + $0x78] sm:$0xf] %vm1404_vm3, %v1370_v37  ;;  %v1175_v35 = vmul.f32 %v2563_v5, %v1058_v38 }
 0x1a5   : > { %v1274_v40 = vadd.f32 %v2580_v10, %v1206_v12 }
 0x1a6   : > { %v1309_v1 = vmax.f32 %v1245_v39, 0.0  ;;  %v1243_v41 = vadd.f32 %v2580_v10, %v1175_v35 }
 0x1a7   : > { %v1338_v62 = vmax.f32 %v1274_v40, 0.0  ;;  %v968_v46 = vpop.f32.mrf.mxu2 }
 0x1a8   : > { %v1373_v61 = vpack.c.bf16 %v1309_v1, %v1309_v1  ;;  %v1307_v47 = vmax.f32 %v1243_v41, 0.0  ;;  %v1138_v49 = vadd.f32 %v1137_v45, %v968_v46 }
 0x1a9   : > { %v1402_v48 = vpack.c.bf16 %v1338_v62, %v1338_v62 }
 0x1aa   : > { %1438 = vst.msk [vmem:[%s2261_s29 + $0x84] sm:$0xf] %vm1404_vm3, %v1373_v61  ;;  %v1371_v50 = vpack.c.bf16 %v1307_v47, %v1307_v47  ;;  %v1207_v51 = vmul.f32 %v2563_v5, %v1138_v49 }
 0x1ab   : > { %1467 = vst.msk [vmem:[%s2261_s29 + $0xf8] sm:$0xf] %vm1404_vm3, %v1402_v48 }
 0x1ac   : > { %1436 = vst.msk [vmem:[%s2261_s29 + $0x7c] sm:$0xf] %vm1404_vm3, %v1371_v50  ;;  %v1275_v52 = vadd.f32 %v2580_v10, %v1207_v51 }
 0x1ae   : > { %v1339_v54 = vmax.f32 %v1275_v52, 0.0 }
 0x1b0   : > { %v1403_v56 = vpack.c.bf16 %v1339_v54, %v1339_v54 }
 0x1b2   : > { %1468 = vst.msk [vmem:[%s2261_s29 + $0xfc] sm:$0xf] %vm1404_vm3, %v1403_v56 }
 0x1b3 PF: > { %s14_s17 = sadd.s32 1, %s2057_s17   ;;  %s2648_s15 = smov %s2053_s16 }
 0x1b4   : > { %p11_p5 = scmp.ge.s32.totalorder %s14_s17, 18   ;;  %s2649_s16 = smov %s2651_s18 }
 0x1b6   :  { %13 = sbr.rel (!%p11_p5) target bundleno = 2 (0x2), region = 75 }

</bundles_post_ra>
